<compile_context>
chip_gen: v6e
topology: v6e:2x2x1
jax: 0.10.0
libtpu: 0.0.40
codegen_flags: <defaults>
</compile_context>

<pallas_src>
import functools
import math

import jax
import jax.numpy as jnp
from jax import lax
from jax.experimental import pallas as pl
from jax.experimental.pallas import tpu as pltpu


# ------------------------------ kernel helpers ----------------------------- #

def _layernorm(x, g, b, eps):
    mu = jnp.mean(x, axis=-1, keepdims=True)
    var = jnp.mean((x - mu) ** 2, axis=-1, keepdims=True)
    return (x - mu) * lax.rsqrt(var + eps) * g + b


def _gelu_tanh(x):
    # TODO(synk): PyTorch nn.GELU default is the exact erf form; the tanh
    # approximation matches to ~1e-3 and lowers cleanly on the EUP.
    c = 0.7978845608028654
    return 0.5 * x * (1.0 + jnp.tanh(c * (x + 0.044715 * x * x * x)))


# ------------------------------ Pallas kernel ------------------------------ #

def gpt_stack_kernel(x_ref, wqkv_ref, wo_ref, w1_ref, w2_ref,
                     vecs_ref, bqkv_ref, b1_ref,
                     o_ref,
                     h_ref, mask_ref,
                     *, num_heads, eps):
    layer = pl.program_id(1)
    n_layers = pl.num_programs(1)
    Bt, T, D = h_ref.shape
    BT = Bt * T
    H = num_heads
    hd = D // H
    f32 = jnp.float32
    bf16 = jnp.bfloat16

    # New batch block: load embedding output into the f32 carry and (re)build
    # the additive causal mask once (cheap; megacore-safe since it runs per
    # batch block, not only at grid step 0).
    @pl.when(layer == 0)
    def _():
        h_ref[...] = x_ref[...].astype(f32)
        r = lax.broadcasted_iota(jnp.int32, (T, T), 0)
        c = lax.broadcasted_iota(jnp.int32, (T, T), 1)
        # Scores stay f32, so a large finite mask constant is safe.
        mask_ref[...] = jnp.where(c <= r, 0.0, -1e30).astype(f32)

    x = h_ref[...].reshape(BT, D)                       # (BT, D) f32 carry
    vecs = vecs_ref[...]                                # (6, D) f32
    g1, be1 = vecs[0:1], vecs[1:2]
    g2, be2 = vecs[2:3], vecs[3:4]
    bo, b2 = vecs[4:5], vecs[5:6]
    mask = mask_ref[...]                                # (T, T) f32 additive

    # ------------- causal multi-head self-attention (pre-LN) -------------- #
    hn = _layernorm(x, g1, be1, eps).astype(bf16)       # (BT, D) bf16
    # One lane-dense fused QKV matmul; 1/sqrt(hd) already folded into wq/bq.
    qkv = jnp.dot(hn, wqkv_ref[...],
                  preferred_element_type=f32) + bqkv_ref[...]   # (BT, 3D) f32

    av_rows = []
    for b in range(Bt):                                 # static, small tile
        row = qkv[b * T:(b + 1) * T]                    # (T, 3D) f32
        heads = []
        for h in range(H):                              # static head loop
            qh = row[:, h * hd:(h + 1) * hd].astype(bf16)
            kh = row[:, D + h * hd:D + (h + 1) * hd].astype(bf16)
            vh = row[:, 2 * D + h * hd:2 * D + (h + 1) * hd].astype(bf16)
            s = jnp.einsum('qd,kd->qk', qh, kh,
                           preferred_element_type=f32) + mask    # (T, T) f32
            s = s - jnp.max(s, axis=-1, keepdims=True)
            p = jnp.exp(s)
            p = p * pl.reciprocal(jnp.sum(p, axis=-1, keepdims=True),
                                  approx=True)
            heads.append(jnp.dot(p.astype(bf16), vh,
                                 preferred_element_type=f32))    # (T, hd) f32
        av_rows.append(jnp.concatenate(heads, axis=-1))          # (T, D)
    av = jnp.concatenate(av_rows, axis=0).astype(bf16)           # (BT, D)

    # Single full-width output projection (K = D).
    attn = jnp.dot(av, wo_ref[...], preferred_element_type=f32) + bo
    x1 = x + attn                                                # (BT, D) f32

    # --------------------------------- MLP --------------------------------- #
    hn2 = _layernorm(x1, g2, be2, eps).astype(bf16)
    a = jnp.dot(hn2, w1_ref[...],
                preferred_element_type=f32) + b1_ref[...]        # (BT, FF) f32
    a = _gelu_tanh(a)
    m = jnp.dot(a.astype(bf16), w2_ref[...],
                preferred_element_type=f32) + b2                 # (BT, D) f32
    out = x1 + m

    h_ref[...] = out.reshape(Bt, T, D)                  # carry to layer + 1

    @pl.when(layer == n_layers - 1)
    def _():
        o_ref[...] = out.reshape(Bt, T, D).astype(o_ref.dtype)


# ------------------------------ JAX wrappers ------------------------------- #

WEIGHT_ORDER = ('wqkv', 'wo', 'w1', 'w2', 'vecs', 'bqkv', 'b1')


def _pack_params(blocks, num_heads):
    """Stack per-layer params with a leading layer axis.

    * wqkv kept fused (D, 3D); 1/sqrt(hd) folded into its q columns / bq.
    * wo kept flat (D, D); w1/w2 flat.  All weight matrices stored bf16.
    * The 6 width-D vectors (ln1 g/b, ln2 g/b, bo, b2) packed into one (6, D)
      f32 array per layer so the pipeline issues fewer, larger DMAs.
    """
    D = blocks[0]['wqkv'].shape[0]
    hd = D // num_heads
    scale = 1.0 / math.sqrt(hd)

    wqkv_l, bqkv_l, wo_l, w1_l, w2_l, b1_l, vec_l = [], [], [], [], [], [], []
    for blk in blocks:
        wqkv = blk['wqkv'].at[:, :D].multiply(scale)     # fold attention scale
        bqkv = blk['bqkv'].at[:, :D].multiply(scale)
        wqkv_l.append(wqkv)
        bqkv_l.append(bqkv)
        wo_l.append(blk['wo'])
        w1_l.append(blk['w1'])
        w2_l.append(blk['w2'])
        b1_l.append(blk['b1'])
        vec_l.append(jnp.concatenate(
            [blk['ln1_g'], blk['ln1_b'], blk['ln2_g'], blk['ln2_b'],
             blk['bo'], blk['b2']], axis=0))             # (6, D)

    return {
        'wqkv': jnp.stack(wqkv_l).astype(jnp.bfloat16),  # (L, D, 3D)
        'wo':   jnp.stack(wo_l).astype(jnp.bfloat16),    # (L, D, D)
        'w1':   jnp.stack(w1_l).astype(jnp.bfloat16),    # (L, D, FF)
        'w2':   jnp.stack(w2_l).astype(jnp.bfloat16),    # (L, FF, D)
        'vecs': jnp.stack(vec_l).astype(jnp.float32),    # (L, 6, D)
        'bqkv': jnp.stack(bqkv_l).astype(jnp.float32),   # (L, 1, 3D)
        'b1':   jnp.stack(b1_l).astype(jnp.float32),     # (L, 1, FF)
    }


def _pick_batch_tile(batch, limit=4):
    """Largest divisor of `batch` <= limit (bounds in-kernel trace size)."""
    bt = 1
    for cand in range(1, min(batch, limit) + 1):
        if batch % cand == 0:
            bt = cand
    return bt


def _vmem_limit_bytes(x, stacked, b_tile, T, D, FF):
    """Per-generation VMEM request: bottom-up double-buffered working set with
    headroom, clamped to ~75% of physical VMEM (96 MiB on v5e/v6e, 48 MiB on
    v7x)."""
    try:
        info = pltpu.get_tpu_info()
        phys = int(getattr(info, 'vmem_capacity_bytes', 64 * 1024 * 1024))
    except Exception:
        phys = 64 * 1024 * 1024
    cap = (phys * 3) // 4

    xb = x.dtype.itemsize
    block_bytes = (2 * b_tile * T * D * xb                       # act in + out
                   + 2 * (3 * D * D + D * D + D * FF + FF * D)   # bf16 weights
                   + 4 * (6 * D + 3 * D + FF))                   # f32 packs
    need = 2 * block_bytes                                       # double-buffer
    need += 4 * (b_tile * T * D + T * T)                         # scratch
    need += 4 * (b_tile * T * (3 * D + FF + 4 * D) + 2 * T * T)  # live temps
    return int(min(max(2 * need, 16 * 1024 * 1024), cap))


def gpt_transformer_stack(x, stacked, *, num_heads, eps):
    """All n_layers transformer blocks as one fused, pipelined pallas_call."""
    B, T, D = x.shape
    L, _, FF = stacked['w1'].shape
    H = num_heads
    Bt = _pick_batch_tile(B)
    NB = B // Bt

    kernel = functools.partial(gpt_stack_kernel, num_heads=num_heads, eps=eps)

    def layer_spec(arr):
        nd = arr.ndim
        return pl.BlockSpec((None,) + arr.shape[1:],
                            lambda nb, l, _nd=nd: (l,) + (0,) * (_nd - 1))

    act_spec = pl.BlockSpec((Bt, T, D), lambda nb, l: (nb, 0, 0))
    in_specs = [act_spec] + [layer_spec(stacked[k]) for k in WEIGHT_ORDER]

    # Advisory FLOP / byte estimate so XLA schedules around the kernel.
    flops = L * B * (2 * T * D * 3 * D        # fused QKV projection
                     + 4 * T * T * D          # QK^T + PV (all heads)
                     + 2 * T * D * D          # output projection
                     + 4 * T * D * FF)        # MLP
    transcendentals = L * B * (H * T * T + T * FF)
    param_bytes = sum(int(a.size) * a.dtype.itemsize for a in stacked.values())
    bytes_accessed = NB * param_bytes + 2 * B * T * D * x.dtype.itemsize

    vmem_bytes = _vmem_limit_bytes(x, stacked, Bt, T, D, FF)

    return pl.pallas_call(
        kernel,
        out_shape=jax.ShapeDtypeStruct((B, T, D), x.dtype),
        grid=(NB, L),
        in_specs=in_specs,
        out_specs=act_spec,
        scratch_shapes=[pltpu.VMEM((Bt, T, D), jnp.float32),   # layer carry
                        pltpu.VMEM((T, T), jnp.float32)],      # causal mask
        compiler_params=pltpu.CompilerParams(
            dimension_semantics=("parallel", "arbitrary"),
            vmem_limit_bytes=vmem_bytes),
        cost_estimate=pl.CostEstimate(flops=flops,
                                      transcendentals=transcendentals,
                                      bytes_accessed=bytes_accessed),
    )(x, *[stacked[k] for k in WEIGHT_ORDER])


def gpt_first_stage(tokens, params, *, num_heads, eps):
    """GPTFirstStage.forward: embedding -> n_layers transformer blocks."""
    B, T = tokens.shape
    # Token + learned positional embedding gather kept as plain-JAX glue.
    h = params['tok_emb'][tokens] + params['pos_emb'][:T][None, :, :]
    stacked = _pack_params(params['blocks'], num_heads)
    return gpt_transformer_stack(h, stacked, num_heads=num_heads, eps=eps)


# --------------------------- deterministic init ----------------------------- #

def init_params(key, *, vocab_size, dmodel, dim_feedforward, ctx_size, n_layers):
    def nrm(k, shape, scale=0.02):
        return (scale * jax.random.normal(k, shape)).astype(jnp.float32)

    keys = jax.random.split(key, 2 + n_layers)
    params = {
        'tok_emb': nrm(keys[0], (vocab_size, dmodel)),
        'pos_emb': nrm(keys[1], (ctx_size, dmodel)),
        'blocks': [],
    }
    for li in range(n_layers):
        ks = jax.random.split(keys[2 + li], 4)
        params['blocks'].append({
            'ln1_g': jnp.ones((1, dmodel), jnp.float32),
            'ln1_b': jnp.zeros((1, dmodel), jnp.float32),
            'wqkv': nrm(ks[0], (dmodel, 3 * dmodel)),
            'bqkv': jnp.zeros((1, 3 * dmodel), jnp.float32),
            'wo': nrm(ks[1], (dmodel, dmodel)),
            'bo': jnp.zeros((1, dmodel), jnp.float32),
            'ln2_g': jnp.ones((1, dmodel), jnp.float32),
            'ln2_b': jnp.zeros((1, dmodel), jnp.float32),
            'w1': nrm(ks[2], (dmodel, dim_feedforward)),
            'b1': jnp.zeros((1, dim_feedforward), jnp.float32),
            'w2': nrm(ks[3], (dim_feedforward, dmodel)),
            'b2': jnp.zeros((1, dmodel), jnp.float32),
        })
    return params


# ----------------------------------- main ----------------------------------- #

if __name__ == "__main__":
    VOCAB = 64
    DMODEL = 32
    NUM_HEADS = 4
    DIM_FF = 4 * DMODEL        # dim_feedforward=0 -> 4*dmodel (GPT convention)
    CTX = 128
    N_LAYERS = 4
    NORM_EPS = 1e-5
    B, T = 2, 8

    key = jax.random.PRNGKey(0)
    pkey, tkey = jax.random.split(key)
    params = init_params(pkey, vocab_size=VOCAB, dmodel=DMODEL,
                         dim_feedforward=DIM_FF, ctx_size=CTX,
                         n_layers=N_LAYERS)
    tokens = jax.random.randint(tkey, (B, T), 0, VOCAB, dtype=jnp.int32)

    fwd = jax.jit(functools.partial(gpt_first_stage,
                                    num_heads=NUM_HEADS, eps=NORM_EPS))
    out = jax.block_until_ready(fwd(tokens, params))

    assert out.shape == (B, T, DMODEL), out.shape
    assert bool(jnp.all(jnp.isfinite(out)))
    print("KERNEL_OK")
</pallas_src>

<mosaic_0001>
module attributes {stable_mosaic.version = 11 : i64} {
  func.func @gpt_stack_kernel(%arg0: i32, %arg1: i32, %arg2: memref<2x8x32xf32, #tpu.memory_space<vmem>>, %arg3: memref<1x32x96xbf16, #tpu.memory_space<vmem>>, %arg4: memref<1x32x32xbf16, #tpu.memory_space<vmem>>, %arg5: memref<1x32x128xbf16, #tpu.memory_space<vmem>>, %arg6: memref<1x128x32xbf16, #tpu.memory_space<vmem>>, %arg7: memref<1x6x32xf32, #tpu.memory_space<vmem>>, %arg8: memref<1x1x96xf32, #tpu.memory_space<vmem>>, %arg9: memref<1x1x128xf32, #tpu.memory_space<vmem>>, %arg10: memref<2x8x32xf32, #tpu.memory_space<vmem>>, %arg11: memref<2x8x32xf32, #tpu.memory_space<vmem>>, %arg12: memref<8x8xf32, #tpu.memory_space<vmem>>) attributes {dimension_semantics = [#tpu.dimension_semantics<parallel>, #tpu.dimension_semantics<arbitrary>], iteration_bounds = array<i64: 1, 4>, scalar_prefetch = 0 : i64, scratch_operands = 2 : i64, tpu.core_type = #tpu.core_type<tc>, window_params = [{transform_indices = @transform_0, window_bounds = array<i64: 2, 8, 32>}, {transform_indices = @transform_1, window_bounds = array<i64: 1, 32, 96>}, {transform_indices = @transform_2, window_bounds = array<i64: 1, 32, 32>}, {transform_indices = @transform_3, window_bounds = array<i64: 1, 32, 128>}, {transform_indices = @transform_4, window_bounds = array<i64: 1, 128, 32>}, {transform_indices = @transform_5, window_bounds = array<i64: 1, 6, 32>}, {transform_indices = @transform_6, window_bounds = array<i64: 1, 1, 96>}, {transform_indices = @transform_7, window_bounds = array<i64: 1, 1, 128>}, {transform_indices = @transform_8, window_bounds = array<i64: 2, 8, 32>}]} {
    %c0_i32 = arith.constant 0 : i32
    %0 = arith.cmpi eq, %arg1, %c0_i32 : i32
    %1 = arith.extui %0 : i1 to i32
    %c0_i32_0 = arith.constant 0 : i32
    %2 = arith.cmpi ne, %1, %c0_i32_0 : i32
    scf.if %2 {
      %c0_79 = arith.constant 0 : index
      %c0_80 = arith.constant 0 : index
      %c0_81 = arith.constant 0 : index
      %271 = vector.load %arg2[%c0_79, %c0_80, %c0_81] : memref<2x8x32xf32, #tpu.memory_space<vmem>>, vector<2x8x32xf32>
      %c0_82 = arith.constant 0 : index
      %c0_83 = arith.constant 0 : index
      %c0_84 = arith.constant 0 : index
      %272 = vector.load %arg11[%c0_82, %c0_83, %c0_84] : memref<2x8x32xf32, #tpu.memory_space<vmem>>, vector<2x8x32xf32>
      tpu.vector_store %arg11[%c0_82, %c0_83, %c0_84], %271 {strides = array<i32>} : memref<2x8x32xf32, #tpu.memory_space<vmem>>, vector<2x8x32xf32>,
      %273 = tpu.iota {dimensions = array<i32: 0>} : vector<8x8xi32>
      %274 = tpu.iota {dimensions = array<i32: 1>} : vector<8x8xi32>
      %275 = arith.cmpi sle, %274, %273 : vector<8x8xi32>
      %cst_85 = arith.constant 0.000000e+00 : f32
      %cst_86 = arith.constant -1.000000e+30 : f32
      %276 = vector.broadcast %cst_85 : f32 to vector<8x8xf32>
      %277 = vector.broadcast %cst_86 : f32 to vector<8x8xf32>
      %278 = arith.select %275, %276, %277 : vector<8x8xi1>, vector<8x8xf32>
      %c0_87 = arith.constant 0 : index
      %c0_88 = arith.constant 0 : index
      %279 = vector.load %arg12[%c0_87, %c0_88] : memref<8x8xf32, #tpu.memory_space<vmem>>, vector<8x8xf32>
      tpu.vector_store %arg12[%c0_87, %c0_88], %278 {strides = array<i32>} : memref<8x8xf32, #tpu.memory_space<vmem>>, vector<8x8xf32>,
    } else {
    }
    %c0 = arith.constant 0 : index
    %c0_1 = arith.constant 0 : index
    %c0_2 = arith.constant 0 : index
    %3 = vector.load %arg11[%c0, %c0_1, %c0_2] : memref<2x8x32xf32, #tpu.memory_space<vmem>>, vector<2x8x32xf32>
    %4 = vector.shape_cast %3 : vector<2x8x32xf32> to vector<16x32xf32>
    %c0_3 = arith.constant 0 : index
    %c0_4 = arith.constant 0 : index
    %c0_5 = arith.constant 0 : index
    %5 = vector.load %arg7[%c0_3, %c0_4, %c0_5] : memref<1x6x32xf32, #tpu.memory_space<vmem>>, vector<1x6x32xf32>
    %6 = vector.shape_cast %5 : vector<1x6x32xf32> to vector<6x32xf32>
    %7 = vector.extract_strided_slice %6 {offsets = [0, 0], sizes = [1, 32], strides = [1, 1]} : vector<6x32xf32> to vector<1x32xf32>
    %8 = vector.extract_strided_slice %6 {offsets = [1, 0], sizes = [1, 32], strides = [1, 1]} : vector<6x32xf32> to vector<1x32xf32>
    %9 = vector.extract_strided_slice %6 {offsets = [2, 0], sizes = [1, 32], strides = [1, 1]} : vector<6x32xf32> to vector<1x32xf32>
    %10 = vector.extract_strided_slice %6 {offsets = [3, 0], sizes = [1, 32], strides = [1, 1]} : vector<6x32xf32> to vector<1x32xf32>
    %11 = vector.extract_strided_slice %6 {offsets = [4, 0], sizes = [1, 32], strides = [1, 1]} : vector<6x32xf32> to vector<1x32xf32>
    %12 = vector.extract_strided_slice %6 {offsets = [5, 0], sizes = [1, 32], strides = [1, 1]} : vector<6x32xf32> to vector<1x32xf32>
    %c0_6 = arith.constant 0 : index
    %c0_7 = arith.constant 0 : index
    %13 = vector.load %arg12[%c0_6, %c0_7] : memref<8x8xf32, #tpu.memory_space<vmem>>, vector<8x8xf32>
    %cst = arith.constant dense<0.000000e+00> : vector<16xf32>
    %14 = vector.multi_reduction <add>, %4, %cst [1] : vector<16x32xf32> to vector<16xf32>
    %15 = vector.shape_cast %14 : vector<16xf32> to vector<16x1xf32>
    %cst_8 = arith.constant 3.200000e+01 : f32
    %16 = vector.broadcast %cst_8 : f32 to vector<16x1xf32>
    %17 = arith.divf %15, %16 : vector<16x1xf32>
    %18 = vector.broadcast %17 : vector<16x1xf32> to vector<16x32xf32>
    %19 = arith.subf %4, %18 : vector<16x32xf32>
    %20 = arith.mulf %19, %19 : vector<16x32xf32>
    %cst_9 = arith.constant dense<0.000000e+00> : vector<16xf32>
    %21 = vector.multi_reduction <add>, %20, %cst_9 [1] : vector<16x32xf32> to vector<16xf32>
    %22 = vector.shape_cast %21 : vector<16xf32> to vector<16x1xf32>
    %cst_10 = arith.constant 3.200000e+01 : f32
    %23 = vector.broadcast %cst_10 : f32 to vector<16x1xf32>
    %24 = arith.divf %22, %23 : vector<16x1xf32>
    %25 = vector.broadcast %17 : vector<16x1xf32> to vector<16x32xf32>
    %26 = arith.subf %4, %25 : vector<16x32xf32>
    %cst_11 = arith.constant 9.99999974E-6 : f32
    %27 = vector.broadcast %cst_11 : f32 to vector<16x1xf32>
    %28 = arith.addf %24, %27 : vector<16x1xf32>
    %29 = math.rsqrt %28 : vector<16x1xf32>
    %30 = vector.broadcast %29 : vector<16x1xf32> to vector<16x32xf32>
    %31 = arith.mulf %26, %30 : vector<16x32xf32>
    %32 = vector.broadcast %7 : vector<1x32xf32> to vector<16x32xf32>
    %33 = arith.mulf %31, %32 : vector<16x32xf32>
    %34 = vector.broadcast %8 : vector<1x32xf32> to vector<16x32xf32>
    %35 = arith.addf %33, %34 : vector<16x32xf32>
    %36 = arith.truncf %35 : vector<16x32xf32> to vector<16x32xbf16>
    %c0_12 = arith.constant 0 : index
    %c0_13 = arith.constant 0 : index
    %c0_14 = arith.constant 0 : index
    %37 = vector.load %arg3[%c0_12, %c0_13, %c0_14] : memref<1x32x96xbf16, #tpu.memory_space<vmem>>, vector<1x32x96xbf16>
    %38 = vector.shape_cast %37 : vector<1x32x96xbf16> to vector<32x96xbf16>
    %cst_15 = arith.constant dense<0.000000e+00> : vector<16x96xf32>
    %39 = tpu.matmul %36, %38, %cst_15 {dimension_numbers = #tpu.dot_dimension_numbers<[1], [0], [0], [1], [0, 0, 1, 1], [], []>} : vector<16x32xbf16>, vector<32x96xbf16>, vector<16x96xf32> -> vector<16x96xf32>
    %c0_16 = arith.constant 0 : index
    %c0_17 = arith.constant 0 : index
    %c0_18 = arith.constant 0 : index
    %40 = vector.load %arg8[%c0_16, %c0_17, %c0_18] : memref<1x1x96xf32, #tpu.memory_space<vmem>>, vector<1x1x96xf32>
    %41 = vector.shape_cast %40 : vector<1x1x96xf32> to vector<1x96xf32>
    %42 = vector.broadcast %41 : vector<1x96xf32> to vector<16x96xf32>
    %43 = arith.addf %39, %42 : vector<16x96xf32>
    %44 = vector.extract_strided_slice %43 {offsets = [0, 0], sizes = [8, 96], strides = [1, 1]} : vector<16x96xf32> to vector<8x96xf32>
    %45 = vector.extract_strided_slice %44 {offsets = [0, 0], sizes = [8, 8], strides = [1, 1]} : vector<8x96xf32> to vector<8x8xf32>
    %46 = arith.truncf %45 : vector<8x8xf32> to vector<8x8xbf16>
    %47 = vector.extract_strided_slice %44 {offsets = [0, 32], sizes = [8, 8], strides = [1, 1]} : vector<8x96xf32> to vector<8x8xf32>
    %48 = arith.truncf %47 : vector<8x8xf32> to vector<8x8xbf16>
    %49 = vector.extract_strided_slice %44 {offsets = [0, 64], sizes = [8, 8], strides = [1, 1]} : vector<8x96xf32> to vector<8x8xf32>
    %50 = arith.truncf %49 : vector<8x8xf32> to vector<8x8xbf16>
    "tpu.trace_start"() <{level = 10 : i32, message = "qd,kd->qk"}> : () -> ()
    %cst_19 = arith.constant dense<0.000000e+00> : vector<8x8xf32>
    %51 = tpu.matmul %46, %48, %cst_19 {dimension_numbers = #tpu.dot_dimension_numbers<[1], [1], [0], [0], [0, 0, 1, 0], [], []>} : vector<8x8xbf16>, vector<8x8xbf16>, vector<8x8xf32> -> vector<8x8xf32>
    "tpu.trace_stop"() : () -> ()
    %52 = arith.addf %51, %13 : vector<8x8xf32>
    %cst_20 = arith.constant dense<0xFF800000> : vector<8xf32>
    %53 = vector.multi_reduction <maximumf>, %52, %cst_20 [1] : vector<8x8xf32> to vector<8xf32>
    %54 = vector.shape_cast %53 : vector<8xf32> to vector<8x1xf32>
    %55 = vector.broadcast %54 : vector<8x1xf32> to vector<8x8xf32>
    %56 = arith.subf %52, %55 : vector<8x8xf32>
    %57 = math.exp %56 : vector<8x8xf32>
    %cst_21 = arith.constant dense<0.000000e+00> : vector<8xf32>
    %58 = vector.multi_reduction <add>, %57, %cst_21 [1] : vector<8x8xf32> to vector<8xf32>
    %59 = vector.shape_cast %58 : vector<8xf32> to vector<8x1xf32>
    %60 = tpu.reciprocal %59 {approx = true} : vector<8x1xf32> -> vector<8x1xf32>
    %61 = vector.broadcast %60 : vector<8x1xf32> to vector<8x8xf32>
    %62 = arith.mulf %57, %61 : vector<8x8xf32>
    %63 = arith.truncf %62 : vector<8x8xf32> to vector<8x8xbf16>
    %cst_22 = arith.constant dense<0.000000e+00> : vector<8x8xf32>
    %64 = tpu.matmul %63, %50, %cst_22 {dimension_numbers = #tpu.dot_dimension_numbers<[1], [0], [0], [1], [0, 0, 1, 1], [], []>} : vector<8x8xbf16>, vector<8x8xbf16>, vector<8x8xf32> -> vector<8x8xf32>
    %65 = vector.extract_strided_slice %44 {offsets = [0, 8], sizes = [8, 8], strides = [1, 1]} : vector<8x96xf32> to vector<8x8xf32>
    %66 = arith.truncf %65 : vector<8x8xf32> to vector<8x8xbf16>
    %67 = vector.extract_strided_slice %44 {offsets = [0, 40], sizes = [8, 8], strides = [1, 1]} : vector<8x96xf32> to vector<8x8xf32>
    %68 = arith.truncf %67 : vector<8x8xf32> to vector<8x8xbf16>
    %69 = vector.extract_strided_slice %44 {offsets = [0, 72], sizes = [8, 8], strides = [1, 1]} : vector<8x96xf32> to vector<8x8xf32>
    %70 = arith.truncf %69 : vector<8x8xf32> to vector<8x8xbf16>
    "tpu.trace_start"() <{level = 10 : i32, message = "qd,kd->qk"}> : () -> ()
    %cst_23 = arith.constant dense<0.000000e+00> : vector<8x8xf32>
    %71 = tpu.matmul %66, %68, %cst_23 {dimension_numbers = #tpu.dot_dimension_numbers<[1], [1], [0], [0], [0, 0, 1, 0], [], []>} : vector<8x8xbf16>, vector<8x8xbf16>, vector<8x8xf32> -> vector<8x8xf32>
    "tpu.trace_stop"() : () -> ()
    %72 = arith.addf %71, %13 : vector<8x8xf32>
    %cst_24 = arith.constant dense<0xFF800000> : vector<8xf32>
    %73 = vector.multi_reduction <maximumf>, %72, %cst_24 [1] : vector<8x8xf32> to vector<8xf32>
    %74 = vector.shape_cast %73 : vector<8xf32> to vector<8x1xf32>
    %75 = vector.broadcast %74 : vector<8x1xf32> to vector<8x8xf32>
    %76 = arith.subf %72, %75 : vector<8x8xf32>
    %77 = math.exp %76 : vector<8x8xf32>
    %cst_25 = arith.constant dense<0.000000e+00> : vector<8xf32>
    %78 = vector.multi_reduction <add>, %77, %cst_25 [1] : vector<8x8xf32> to vector<8xf32>
    %79 = vector.shape_cast %78 : vector<8xf32> to vector<8x1xf32>
    %80 = tpu.reciprocal %79 {approx = true} : vector<8x1xf32> -> vector<8x1xf32>
    %81 = vector.broadcast %80 : vector<8x1xf32> to vector<8x8xf32>
    %82 = arith.mulf %77, %81 : vector<8x8xf32>
    %83 = arith.truncf %82 : vector<8x8xf32> to vector<8x8xbf16>
    %cst_26 = arith.constant dense<0.000000e+00> : vector<8x8xf32>
    %84 = tpu.matmul %83, %70, %cst_26 {dimension_numbers = #tpu.dot_dimension_numbers<[1], [0], [0], [1], [0, 0, 1, 1], [], []>} : vector<8x8xbf16>, vector<8x8xbf16>, vector<8x8xf32> -> vector<8x8xf32>
    %85 = vector.extract_strided_slice %44 {offsets = [0, 16], sizes = [8, 8], strides = [1, 1]} : vector<8x96xf32> to vector<8x8xf32>
    %86 = arith.truncf %85 : vector<8x8xf32> to vector<8x8xbf16>
    %87 = vector.extract_strided_slice %44 {offsets = [0, 48], sizes = [8, 8], strides = [1, 1]} : vector<8x96xf32> to vector<8x8xf32>
    %88 = arith.truncf %87 : vector<8x8xf32> to vector<8x8xbf16>
    %89 = vector.extract_strided_slice %44 {offsets = [0, 80], sizes = [8, 8], strides = [1, 1]} : vector<8x96xf32> to vector<8x8xf32>
    %90 = arith.truncf %89 : vector<8x8xf32> to vector<8x8xbf16>
    "tpu.trace_start"() <{level = 10 : i32, message = "qd,kd->qk"}> : () -> ()
    %cst_27 = arith.constant dense<0.000000e+00> : vector<8x8xf32>
    %91 = tpu.matmul %86, %88, %cst_27 {dimension_numbers = #tpu.dot_dimension_numbers<[1], [1], [0], [0], [0, 0, 1, 0], [], []>} : vector<8x8xbf16>, vector<8x8xbf16>, vector<8x8xf32> -> vector<8x8xf32>
    "tpu.trace_stop"() : () -> ()
    %92 = arith.addf %91, %13 : vector<8x8xf32>
    %cst_28 = arith.constant dense<0xFF800000> : vector<8xf32>
    %93 = vector.multi_reduction <maximumf>, %92, %cst_28 [1] : vector<8x8xf32> to vector<8xf32>
    %94 = vector.shape_cast %93 : vector<8xf32> to vector<8x1xf32>
    %95 = vector.broadcast %94 : vector<8x1xf32> to vector<8x8xf32>
    %96 = arith.subf %92, %95 : vector<8x8xf32>
    %97 = math.exp %96 : vector<8x8xf32>
    %cst_29 = arith.constant dense<0.000000e+00> : vector<8xf32>
    %98 = vector.multi_reduction <add>, %97, %cst_29 [1] : vector<8x8xf32> to vector<8xf32>
    %99 = vector.shape_cast %98 : vector<8xf32> to vector<8x1xf32>
    %100 = tpu.reciprocal %99 {approx = true} : vector<8x1xf32> -> vector<8x1xf32>
    %101 = vector.broadcast %100 : vector<8x1xf32> to vector<8x8xf32>
    %102 = arith.mulf %97, %101 : vector<8x8xf32>
    %103 = arith.truncf %102 : vector<8x8xf32> to vector<8x8xbf16>
    %cst_30 = arith.constant dense<0.000000e+00> : vector<8x8xf32>
    %104 = tpu.matmul %103, %90, %cst_30 {dimension_numbers = #tpu.dot_dimension_numbers<[1], [0], [0], [1], [0, 0, 1, 1], [], []>} : vector<8x8xbf16>, vector<8x8xbf16>, vector<8x8xf32> -> vector<8x8xf32>
    %105 = vector.extract_strided_slice %44 {offsets = [0, 24], sizes = [8, 8], strides = [1, 1]} : vector<8x96xf32> to vector<8x8xf32>
    %106 = arith.truncf %105 : vector<8x8xf32> to vector<8x8xbf16>
    %107 = vector.extract_strided_slice %44 {offsets = [0, 56], sizes = [8, 8], strides = [1, 1]} : vector<8x96xf32> to vector<8x8xf32>
    %108 = arith.truncf %107 : vector<8x8xf32> to vector<8x8xbf16>
    %109 = vector.extract_strided_slice %44 {offsets = [0, 88], sizes = [8, 8], strides = [1, 1]} : vector<8x96xf32> to vector<8x8xf32>
    %110 = arith.truncf %109 : vector<8x8xf32> to vector<8x8xbf16>
    "tpu.trace_start"() <{level = 10 : i32, message = "qd,kd->qk"}> : () -> ()
    %cst_31 = arith.constant dense<0.000000e+00> : vector<8x8xf32>
    %111 = tpu.matmul %106, %108, %cst_31 {dimension_numbers = #tpu.dot_dimension_numbers<[1], [1], [0], [0], [0, 0, 1, 0], [], []>} : vector<8x8xbf16>, vector<8x8xbf16>, vector<8x8xf32> -> vector<8x8xf32>
    "tpu.trace_stop"() : () -> ()
    %112 = arith.addf %111, %13 : vector<8x8xf32>
    %cst_32 = arith.constant dense<0xFF800000> : vector<8xf32>
    %113 = vector.multi_reduction <maximumf>, %112, %cst_32 [1] : vector<8x8xf32> to vector<8xf32>
    %114 = vector.shape_cast %113 : vector<8xf32> to vector<8x1xf32>
    %115 = vector.broadcast %114 : vector<8x1xf32> to vector<8x8xf32>
    %116 = arith.subf %112, %115 : vector<8x8xf32>
    %117 = math.exp %116 : vector<8x8xf32>
    %cst_33 = arith.constant dense<0.000000e+00> : vector<8xf32>
    %118 = vector.multi_reduction <add>, %117, %cst_33 [1] : vector<8x8xf32> to vector<8xf32>
    %119 = vector.shape_cast %118 : vector<8xf32> to vector<8x1xf32>
    %120 = tpu.reciprocal %119 {approx = true} : vector<8x1xf32> -> vector<8x1xf32>
    %121 = vector.broadcast %120 : vector<8x1xf32> to vector<8x8xf32>
    %122 = arith.mulf %117, %121 : vector<8x8xf32>
    %123 = arith.truncf %122 : vector<8x8xf32> to vector<8x8xbf16>
    %cst_34 = arith.constant dense<0.000000e+00> : vector<8x8xf32>
    %124 = tpu.matmul %123, %110, %cst_34 {dimension_numbers = #tpu.dot_dimension_numbers<[1], [0], [0], [1], [0, 0, 1, 1], [], []>} : vector<8x8xbf16>, vector<8x8xbf16>, vector<8x8xf32> -> vector<8x8xf32>
    %125 = tpu.concatenate %64, %84, %104, %124 in 1 : vector<8x8xf32>, vector<8x8xf32>, vector<8x8xf32>, vector<8x8xf32> -> vector<8x32xf32>
    %126 = vector.extract_strided_slice %43 {offsets = [8, 0], sizes = [8, 96], strides = [1, 1]} : vector<16x96xf32> to vector<8x96xf32>
    %127 = vector.extract_strided_slice %126 {offsets = [0, 0], sizes = [8, 8], strides = [1, 1]} : vector<8x96xf32> to vector<8x8xf32>
    %128 = arith.truncf %127 : vector<8x8xf32> to vector<8x8xbf16>
    %129 = vector.extract_strided_slice %126 {offsets = [0, 32], sizes = [8, 8], strides = [1, 1]} : vector<8x96xf32> to vector<8x8xf32>
    %130 = arith.truncf %129 : vector<8x8xf32> to vector<8x8xbf16>
    %131 = vector.extract_strided_slice %126 {offsets = [0, 64], sizes = [8, 8], strides = [1, 1]} : vector<8x96xf32> to vector<8x8xf32>
    %132 = arith.truncf %131 : vector<8x8xf32> to vector<8x8xbf16>
    "tpu.trace_start"() <{level = 10 : i32, message = "qd,kd->qk"}> : () -> ()
    %cst_35 = arith.constant dense<0.000000e+00> : vector<8x8xf32>
    %133 = tpu.matmul %128, %130, %cst_35 {dimension_numbers = #tpu.dot_dimension_numbers<[1], [1], [0], [0], [0, 0, 1, 0], [], []>} : vector<8x8xbf16>, vector<8x8xbf16>, vector<8x8xf32> -> vector<8x8xf32>
    "tpu.trace_stop"() : () -> ()
    %134 = arith.addf %133, %13 : vector<8x8xf32>
    %cst_36 = arith.constant dense<0xFF800000> : vector<8xf32>
    %135 = vector.multi_reduction <maximumf>, %134, %cst_36 [1] : vector<8x8xf32> to vector<8xf32>
    %136 = vector.shape_cast %135 : vector<8xf32> to vector<8x1xf32>
    %137 = vector.broadcast %136 : vector<8x1xf32> to vector<8x8xf32>
    %138 = arith.subf %134, %137 : vector<8x8xf32>
    %139 = math.exp %138 : vector<8x8xf32>
    %cst_37 = arith.constant dense<0.000000e+00> : vector<8xf32>
    %140 = vector.multi_reduction <add>, %139, %cst_37 [1] : vector<8x8xf32> to vector<8xf32>
    %141 = vector.shape_cast %140 : vector<8xf32> to vector<8x1xf32>
    %142 = tpu.reciprocal %141 {approx = true} : vector<8x1xf32> -> vector<8x1xf32>
    %143 = vector.broadcast %142 : vector<8x1xf32> to vector<8x8xf32>
    %144 = arith.mulf %139, %143 : vector<8x8xf32>
    %145 = arith.truncf %144 : vector<8x8xf32> to vector<8x8xbf16>
    %cst_38 = arith.constant dense<0.000000e+00> : vector<8x8xf32>
    %146 = tpu.matmul %145, %132, %cst_38 {dimension_numbers = #tpu.dot_dimension_numbers<[1], [0], [0], [1], [0, 0, 1, 1], [], []>} : vector<8x8xbf16>, vector<8x8xbf16>, vector<8x8xf32> -> vector<8x8xf32>
    %147 = vector.extract_strided_slice %126 {offsets = [0, 8], sizes = [8, 8], strides = [1, 1]} : vector<8x96xf32> to vector<8x8xf32>
    %148 = arith.truncf %147 : vector<8x8xf32> to vector<8x8xbf16>
    %149 = vector.extract_strided_slice %126 {offsets = [0, 40], sizes = [8, 8], strides = [1, 1]} : vector<8x96xf32> to vector<8x8xf32>
    %150 = arith.truncf %149 : vector<8x8xf32> to vector<8x8xbf16>
    %151 = vector.extract_strided_slice %126 {offsets = [0, 72], sizes = [8, 8], strides = [1, 1]} : vector<8x96xf32> to vector<8x8xf32>
    %152 = arith.truncf %151 : vector<8x8xf32> to vector<8x8xbf16>
    "tpu.trace_start"() <{level = 10 : i32, message = "qd,kd->qk"}> : () -> ()
    %cst_39 = arith.constant dense<0.000000e+00> : vector<8x8xf32>
    %153 = tpu.matmul %148, %150, %cst_39 {dimension_numbers = #tpu.dot_dimension_numbers<[1], [1], [0], [0], [0, 0, 1, 0], [], []>} : vector<8x8xbf16>, vector<8x8xbf16>, vector<8x8xf32> -> vector<8x8xf32>
    "tpu.trace_stop"() : () -> ()
    %154 = arith.addf %153, %13 : vector<8x8xf32>
    %cst_40 = arith.constant dense<0xFF800000> : vector<8xf32>
    %155 = vector.multi_reduction <maximumf>, %154, %cst_40 [1] : vector<8x8xf32> to vector<8xf32>
    %156 = vector.shape_cast %155 : vector<8xf32> to vector<8x1xf32>
    %157 = vector.broadcast %156 : vector<8x1xf32> to vector<8x8xf32>
    %158 = arith.subf %154, %157 : vector<8x8xf32>
    %159 = math.exp %158 : vector<8x8xf32>
    %cst_41 = arith.constant dense<0.000000e+00> : vector<8xf32>
    %160 = vector.multi_reduction <add>, %159, %cst_41 [1] : vector<8x8xf32> to vector<8xf32>
    %161 = vector.shape_cast %160 : vector<8xf32> to vector<8x1xf32>
    %162 = tpu.reciprocal %161 {approx = true} : vector<8x1xf32> -> vector<8x1xf32>
    %163 = vector.broadcast %162 : vector<8x1xf32> to vector<8x8xf32>
    %164 = arith.mulf %159, %163 : vector<8x8xf32>
    %165 = arith.truncf %164 : vector<8x8xf32> to vector<8x8xbf16>
    %cst_42 = arith.constant dense<0.000000e+00> : vector<8x8xf32>
    %166 = tpu.matmul %165, %152, %cst_42 {dimension_numbers = #tpu.dot_dimension_numbers<[1], [0], [0], [1], [0, 0, 1, 1], [], []>} : vector<8x8xbf16>, vector<8x8xbf16>, vector<8x8xf32> -> vector<8x8xf32>
    %167 = vector.extract_strided_slice %126 {offsets = [0, 16], sizes = [8, 8], strides = [1, 1]} : vector<8x96xf32> to vector<8x8xf32>
    %168 = arith.truncf %167 : vector<8x8xf32> to vector<8x8xbf16>
    %169 = vector.extract_strided_slice %126 {offsets = [0, 48], sizes = [8, 8], strides = [1, 1]} : vector<8x96xf32> to vector<8x8xf32>
    %170 = arith.truncf %169 : vector<8x8xf32> to vector<8x8xbf16>
    %171 = vector.extract_strided_slice %126 {offsets = [0, 80], sizes = [8, 8], strides = [1, 1]} : vector<8x96xf32> to vector<8x8xf32>
    %172 = arith.truncf %171 : vector<8x8xf32> to vector<8x8xbf16>
    "tpu.trace_start"() <{level = 10 : i32, message = "qd,kd->qk"}> : () -> ()
    %cst_43 = arith.constant dense<0.000000e+00> : vector<8x8xf32>
    %173 = tpu.matmul %168, %170, %cst_43 {dimension_numbers = #tpu.dot_dimension_numbers<[1], [1], [0], [0], [0, 0, 1, 0], [], []>} : vector<8x8xbf16>, vector<8x8xbf16>, vector<8x8xf32> -> vector<8x8xf32>
    "tpu.trace_stop"() : () -> ()
    %174 = arith.addf %173, %13 : vector<8x8xf32>
    %cst_44 = arith.constant dense<0xFF800000> : vector<8xf32>
    %175 = vector.multi_reduction <maximumf>, %174, %cst_44 [1] : vector<8x8xf32> to vector<8xf32>
    %176 = vector.shape_cast %175 : vector<8xf32> to vector<8x1xf32>
    %177 = vector.broadcast %176 : vector<8x1xf32> to vector<8x8xf32>
    %178 = arith.subf %174, %177 : vector<8x8xf32>
    %179 = math.exp %178 : vector<8x8xf32>
    %cst_45 = arith.constant dense<0.000000e+00> : vector<8xf32>
    %180 = vector.multi_reduction <add>, %179, %cst_45 [1] : vector<8x8xf32> to vector<8xf32>
    %181 = vector.shape_cast %180 : vector<8xf32> to vector<8x1xf32>
    %182 = tpu.reciprocal %181 {approx = true} : vector<8x1xf32> -> vector<8x1xf32>
    %183 = vector.broadcast %182 : vector<8x1xf32> to vector<8x8xf32>
    %184 = arith.mulf %179, %183 : vector<8x8xf32>
    %185 = arith.truncf %184 : vector<8x8xf32> to vector<8x8xbf16>
    %cst_46 = arith.constant dense<0.000000e+00> : vector<8x8xf32>
    %186 = tpu.matmul %185, %172, %cst_46 {dimension_numbers = #tpu.dot_dimension_numbers<[1], [0], [0], [1], [0, 0, 1, 1], [], []>} : vector<8x8xbf16>, vector<8x8xbf16>, vector<8x8xf32> -> vector<8x8xf32>
    %187 = vector.extract_strided_slice %126 {offsets = [0, 24], sizes = [8, 8], strides = [1, 1]} : vector<8x96xf32> to vector<8x8xf32>
    %188 = arith.truncf %187 : vector<8x8xf32> to vector<8x8xbf16>
    %189 = vector.extract_strided_slice %126 {offsets = [0, 56], sizes = [8, 8], strides = [1, 1]} : vector<8x96xf32> to vector<8x8xf32>
    %190 = arith.truncf %189 : vector<8x8xf32> to vector<8x8xbf16>
    %191 = vector.extract_strided_slice %126 {offsets = [0, 88], sizes = [8, 8], strides = [1, 1]} : vector<8x96xf32> to vector<8x8xf32>
    %192 = arith.truncf %191 : vector<8x8xf32> to vector<8x8xbf16>
    "tpu.trace_start"() <{level = 10 : i32, message = "qd,kd->qk"}> : () -> ()
    %cst_47 = arith.constant dense<0.000000e+00> : vector<8x8xf32>
    %193 = tpu.matmul %188, %190, %cst_47 {dimension_numbers = #tpu.dot_dimension_numbers<[1], [1], [0], [0], [0, 0, 1, 0], [], []>} : vector<8x8xbf16>, vector<8x8xbf16>, vector<8x8xf32> -> vector<8x8xf32>
    "tpu.trace_stop"() : () -> ()
    %194 = arith.addf %193, %13 : vector<8x8xf32>
    %cst_48 = arith.constant dense<0xFF800000> : vector<8xf32>
    %195 = vector.multi_reduction <maximumf>, %194, %cst_48 [1] : vector<8x8xf32> to vector<8xf32>
    %196 = vector.shape_cast %195 : vector<8xf32> to vector<8x1xf32>
    %197 = vector.broadcast %196 : vector<8x1xf32> to vector<8x8xf32>
    %198 = arith.subf %194, %197 : vector<8x8xf32>
    %199 = math.exp %198 : vector<8x8xf32>
    %cst_49 = arith.constant dense<0.000000e+00> : vector<8xf32>
    %200 = vector.multi_reduction <add>, %199, %cst_49 [1] : vector<8x8xf32> to vector<8xf32>
    %201 = vector.shape_cast %200 : vector<8xf32> to vector<8x1xf32>
    %202 = tpu.reciprocal %201 {approx = true} : vector<8x1xf32> -> vector<8x1xf32>
    %203 = vector.broadcast %202 : vector<8x1xf32> to vector<8x8xf32>
    %204 = arith.mulf %199, %203 : vector<8x8xf32>
    %205 = arith.truncf %204 : vector<8x8xf32> to vector<8x8xbf16>
    %cst_50 = arith.constant dense<0.000000e+00> : vector<8x8xf32>
    %206 = tpu.matmul %205, %192, %cst_50 {dimension_numbers = #tpu.dot_dimension_numbers<[1], [0], [0], [1], [0, 0, 1, 1], [], []>} : vector<8x8xbf16>, vector<8x8xbf16>, vector<8x8xf32> -> vector<8x8xf32>
    %207 = tpu.concatenate %146, %166, %186, %206 in 1 : vector<8x8xf32>, vector<8x8xf32>, vector<8x8xf32>, vector<8x8xf32> -> vector<8x32xf32>
    %208 = tpu.concatenate %125, %207 in 0 : vector<8x32xf32>, vector<8x32xf32> -> vector<16x32xf32>
    %209 = arith.truncf %208 : vector<16x32xf32> to vector<16x32xbf16>
    %c0_51 = arith.constant 0 : index
    %c0_52 = arith.constant 0 : index
    %c0_53 = arith.constant 0 : index
    %210 = vector.load %arg4[%c0_51, %c0_52, %c0_53] : memref<1x32x32xbf16, #tpu.memory_space<vmem>>, vector<1x32x32xbf16>
    %211 = vector.shape_cast %210 : vector<1x32x32xbf16> to vector<32x32xbf16>
    %cst_54 = arith.constant dense<0.000000e+00> : vector<16x32xf32>
    %212 = tpu.matmul %209, %211, %cst_54 {dimension_numbers = #tpu.dot_dimension_numbers<[1], [0], [0], [1], [0, 0, 1, 1], [], []>} : vector<16x32xbf16>, vector<32x32xbf16>, vector<16x32xf32> -> vector<16x32xf32>
    %213 = vector.broadcast %11 : vector<1x32xf32> to vector<16x32xf32>
    %214 = arith.addf %212, %213 : vector<16x32xf32>
    %215 = arith.addf %4, %214 : vector<16x32xf32>
    %cst_55 = arith.constant dense<0.000000e+00> : vector<16xf32>
    %216 = vector.multi_reduction <add>, %215, %cst_55 [1] : vector<16x32xf32> to vector<16xf32>
    %217 = vector.shape_cast %216 : vector<16xf32> to vector<16x1xf32>
    %cst_56 = arith.constant 3.200000e+01 : f32
    %218 = vector.broadcast %cst_56 : f32 to vector<16x1xf32>
    %219 = arith.divf %217, %218 : vector<16x1xf32>
    %220 = vector.broadcast %219 : vector<16x1xf32> to vector<16x32xf32>
    %221 = arith.subf %215, %220 : vector<16x32xf32>
    %222 = arith.mulf %221, %221 : vector<16x32xf32>
    %cst_57 = arith.constant dense<0.000000e+00> : vector<16xf32>
    %223 = vector.multi_reduction <add>, %222, %cst_57 [1] : vector<16x32xf32> to vector<16xf32>
    %224 = vector.shape_cast %223 : vector<16xf32> to vector<16x1xf32>
    %cst_58 = arith.constant 3.200000e+01 : f32
    %225 = vector.broadcast %cst_58 : f32 to vector<16x1xf32>
    %226 = arith.divf %224, %225 : vector<16x1xf32>
    %227 = vector.broadcast %219 : vector<16x1xf32> to vector<16x32xf32>
    %228 = arith.subf %215, %227 : vector<16x32xf32>
    %cst_59 = arith.constant 9.99999974E-6 : f32
    %229 = vector.broadcast %cst_59 : f32 to vector<16x1xf32>
    %230 = arith.addf %226, %229 : vector<16x1xf32>
    %231 = math.rsqrt %230 : vector<16x1xf32>
    %232 = vector.broadcast %231 : vector<16x1xf32> to vector<16x32xf32>
    %233 = arith.mulf %228, %232 : vector<16x32xf32>
    %234 = vector.broadcast %9 : vector<1x32xf32> to vector<16x32xf32>
    %235 = arith.mulf %233, %234 : vector<16x32xf32>
    %236 = vector.broadcast %10 : vector<1x32xf32> to vector<16x32xf32>
    %237 = arith.addf %235, %236 : vector<16x32xf32>
    %238 = arith.truncf %237 : vector<16x32xf32> to vector<16x32xbf16>
    %c0_60 = arith.constant 0 : index
    %c0_61 = arith.constant 0 : index
    %c0_62 = arith.constant 0 : index
    %239 = vector.load %arg5[%c0_60, %c0_61, %c0_62] : memref<1x32x128xbf16, #tpu.memory_space<vmem>>, vector<1x32x128xbf16>
    %240 = vector.shape_cast %239 : vector<1x32x128xbf16> to vector<32x128xbf16>
    %cst_63 = arith.constant dense<0.000000e+00> : vector<16x128xf32>
    %241 = tpu.matmul %238, %240, %cst_63 {dimension_numbers = #tpu.dot_dimension_numbers<[1], [0], [0], [1], [0, 0, 1, 1], [], []>} : vector<16x32xbf16>, vector<32x128xbf16>, vector<16x128xf32> -> vector<16x128xf32>
    %c0_64 = arith.constant 0 : index
    %c0_65 = arith.constant 0 : index
    %c0_66 = arith.constant 0 : index
    %242 = vector.load %arg9[%c0_64, %c0_65, %c0_66] : memref<1x1x128xf32, #tpu.memory_space<vmem>>, vector<1x1x128xf32>
    %243 = vector.shape_cast %242 : vector<1x1x128xf32> to vector<1x128xf32>
    %244 = vector.broadcast %243 : vector<1x128xf32> to vector<16x128xf32>
    %245 = arith.addf %241, %244 : vector<16x128xf32>
    %cst_67 = arith.constant 5.000000e-01 : f32
    %246 = vector.broadcast %cst_67 : f32 to vector<16x128xf32>
    %247 = arith.mulf %246, %245 : vector<16x128xf32>
    %cst_68 = arith.constant 4.471500e-02 : f32
    %248 = vector.broadcast %cst_68 : f32 to vector<16x128xf32>
    %249 = arith.mulf %248, %245 : vector<16x128xf32>
    %250 = arith.mulf %249, %245 : vector<16x128xf32>
    %251 = arith.mulf %250, %245 : vector<16x128xf32>
    %252 = arith.addf %245, %251 : vector<16x128xf32>
    %cst_69 = arith.constant 0.797884583 : f32
    %253 = vector.broadcast %cst_69 : f32 to vector<16x128xf32>
    %254 = arith.mulf %253, %252 : vector<16x128xf32>
    %255 = math.tanh %254 : vector<16x128xf32>
    %cst_70 = arith.constant 1.000000e+00 : f32
    %256 = vector.broadcast %cst_70 : f32 to vector<16x128xf32>
    %257 = arith.addf %256, %255 : vector<16x128xf32>
    %258 = arith.mulf %247, %257 : vector<16x128xf32>
    %259 = arith.truncf %258 : vector<16x128xf32> to vector<16x128xbf16>
    %c0_71 = arith.constant 0 : index
    %c0_72 = arith.constant 0 : index
    %c0_73 = arith.constant 0 : index
    %260 = vector.load %arg6[%c0_71, %c0_72, %c0_73] : memref<1x128x32xbf16, #tpu.memory_space<vmem>>, vector<1x128x32xbf16>
    %261 = vector.shape_cast %260 : vector<1x128x32xbf16> to vector<128x32xbf16>
    %cst_74 = arith.constant dense<0.000000e+00> : vector<16x32xf32>
    %262 = tpu.matmul %259, %261, %cst_74 {dimension_numbers = #tpu.dot_dimension_numbers<[1], [0], [0], [1], [0, 0, 1, 1], [], []>} : vector<16x128xbf16>, vector<128x32xbf16>, vector<16x32xf32> -> vector<16x32xf32>
    %263 = vector.broadcast %12 : vector<1x32xf32> to vector<16x32xf32>
    %264 = arith.addf %262, %263 : vector<16x32xf32>
    %265 = arith.addf %215, %264 : vector<16x32xf32>
    %266 = vector.shape_cast %265 : vector<16x32xf32> to vector<2x8x32xf32>
    %c0_75 = arith.constant 0 : index
    %c0_76 = arith.constant 0 : index
    %c0_77 = arith.constant 0 : index
    %267 = vector.load %arg11[%c0_75, %c0_76, %c0_77] : memref<2x8x32xf32, #tpu.memory_space<vmem>>, vector<2x8x32xf32>
    tpu.vector_store %arg11[%c0_75, %c0_76, %c0_77], %266 {strides = array<i32>} : memref<2x8x32xf32, #tpu.memory_space<vmem>>, vector<2x8x32xf32>,
    %c3_i32 = arith.constant 3 : i32
    %268 = arith.cmpi eq, %arg1, %c3_i32 : i32
    %269 = arith.extui %268 : i1 to i32
    %c0_i32_78 = arith.constant 0 : i32
    %270 = arith.cmpi ne, %269, %c0_i32_78 : i32
    scf.if %270 {
      %271 = vector.shape_cast %265 : vector<16x32xf32> to vector<2x8x32xf32>
      %c0_79 = arith.constant 0 : index
      %c0_80 = arith.constant 0 : index
      %c0_81 = arith.constant 0 : index
      %272 = vector.load %arg10[%c0_79, %c0_80, %c0_81] : memref<2x8x32xf32, #tpu.memory_space<vmem>>, vector<2x8x32xf32>
      tpu.vector_store %arg10[%c0_79, %c0_80, %c0_81], %271 {strides = array<i32>} : memref<2x8x32xf32, #tpu.memory_space<vmem>>, vector<2x8x32xf32>,
    } else {
    }
    return
  }
  func.func @transform_0(%arg0: i32, %arg1: i32) -> (i32, i32, i32) {
    %c0_i32 = arith.constant 0 : i32
    %c0_i32_0 = arith.constant 0 : i32
    %c0_i32_1 = arith.constant 0 : i32
    return %arg0, %c0_i32, %c0_i32_0 : i32, i32, i32
  }
  func.func @transform_1(%arg0: i32, %arg1: i32) -> (i32, i32, i32) {
    %c0_i32 = arith.constant 0 : i32
    %c0_i32_0 = arith.constant 0 : i32
    %c0_i32_1 = arith.constant 0 : i32
    return %arg1, %c0_i32, %c0_i32_0 : i32, i32, i32
  }
  func.func @transform_2(%arg0: i32, %arg1: i32) -> (i32, i32, i32) {
    %c0_i32 = arith.constant 0 : i32
    %c0_i32_0 = arith.constant 0 : i32
    %c0_i32_1 = arith.constant 0 : i32
    return %arg1, %c0_i32, %c0_i32_0 : i32, i32, i32
  }
  func.func @transform_3(%arg0: i32, %arg1: i32) -> (i32, i32, i32) {
    %c0_i32 = arith.constant 0 : i32
    %c0_i32_0 = arith.constant 0 : i32
    %c0_i32_1 = arith.constant 0 : i32
    return %arg1, %c0_i32, %c0_i32_0 : i32, i32, i32
  }
  func.func @transform_4(%arg0: i32, %arg1: i32) -> (i32, i32, i32) {
    %c0_i32 = arith.constant 0 : i32
    %c0_i32_0 = arith.constant 0 : i32
    %c0_i32_1 = arith.constant 0 : i32
    return %arg1, %c0_i32, %c0_i32_0 : i32, i32, i32
  }
  func.func @transform_5(%arg0: i32, %arg1: i32) -> (i32, i32, i32) {
    %c0_i32 = arith.constant 0 : i32
    %c0_i32_0 = arith.constant 0 : i32
    %c0_i32_1 = arith.constant 0 : i32
    return %arg1, %c0_i32, %c0_i32_0 : i32, i32, i32
  }
  func.func @transform_6(%arg0: i32, %arg1: i32) -> (i32, i32, i32) {
    %c0_i32 = arith.constant 0 : i32
    %c0_i32_0 = arith.constant 0 : i32
    %c0_i32_1 = arith.constant 0 : i32
    return %arg1, %c0_i32, %c0_i32_0 : i32, i32, i32
  }
  func.func @transform_7(%arg0: i32, %arg1: i32) -> (i32, i32, i32) {
    %c0_i32 = arith.constant 0 : i32
    %c0_i32_0 = arith.constant 0 : i32
    %c0_i32_1 = arith.constant 0 : i32
    return %arg1, %c0_i32, %c0_i32_0 : i32, i32, i32
  }
  func.func @transform_8(%arg0: i32, %arg1: i32) -> (i32, i32, i32) {
    %c0_i32 = arith.constant 0 : i32
    %c0_i32_0 = arith.constant 0 : i32
    %c0_i32_1 = arith.constant 0 : i32
    return %arg0, %c0_i32, %c0_i32_0 : i32, i32, i32
  }
}

</mosaic_0001>

<bundles_post_ra>
// kernel: gpt_first_stage.1
= control target key start
LH: loop header
LB: loop body
LE: loop exit
PB: predicated region body
PF: predicated region fallthrough
CT: control target
= control target key end

     0   :  { %s2785_s0 = inlined_call_operand.vmem [shape: f32[2,8,32], index: 0, kind: input, shape index: {}]   ;;  %s2786_s1 = inlined_call_operand.vmem [shape: bf16[4,32,96], index: 1, kind: input, shape index: {}]   ;;  %s2787_s2 = inlined_call_operand.vmem [shape: bf16[4,32,32], index: 2, kind: input, shape index: {}]   ;;  %s2788_s3 = inlined_call_operand.vmem [shape: bf16[4,32,128], index: 3, kind: input, shape index: {}]   ;;  %s2789_s4 = inlined_call_operand.vmem [shape: bf16[4,128,32], index: 4, kind: input, shape index: {}]   ;;  %s2790_s5 = inlined_call_operand.vmem [shape: f32[4,6,32], index: 5, kind: input, shape index: {}]   ;;  %s2791_s6 = inlined_call_operand.vmem [shape: f32[4,1,96], index: 6, kind: input, shape index: {}]   ;;  %s2792_s7 = inlined_call_operand.vmem [shape: f32[4,1,128], index: 7, kind: input, shape index: {}]   ;;  %s2793_s8 = inlined_call_operand.hbm [shape: f32[2,8,32], index: 8, kind: output, shape index: {}]  }
   0x1   :  { %2794 = sst [smem:[#allocation7_spill]] %s2786_s1 }
   0x2   :  { %2795 = sst [smem:[#allocation8_spill]] %s2787_s2 }
   0x3   :  { %13 = vsyncpa [#allocation5], 0  ;;  %s2422_s27 = smov 0   ;;  %s2424_s28 = smov 0  }
   0x4   :  { %s2426_s29 = smov 0  }
   0x5 LB: > { %s28_s9 = sadd.s32 1, %s2352_s28  ;;  %p1939_p1 = scmp.ge.s32.totalorder %s2356_s29, 1  ;;  %s2356_s29 = sphi %s2426_s29, %s19_s29   ;;  %s2352_s28 = sphi %s2424_s28, %s2801_s28   ;;  %s2348_s27 = sphi %s2422_s27, %s2800_s27  }
   0x6   : > { %p29_p0 = scmp.ge.s32.totalorder %s28_s9, 4  ;;  %p341_p2 = scmp.lt.s32.totalorder %s2356_s29, 5 }
   0x8   : > { %s2803_s9 = smov (%p29_p0, %s28_s9), 0  ;;  %p342_p3 = pnand %p1939_p1, %p341_p2 }
   0x9   : > { %p406_p4 = scmp.lt.s32.totalorder (!%p342_p3), %s2348_s27, 3  ;;  %s2796_s1 = sld [smem:[#allocation7_spill]] (!%p342_p3) }
   0xa   : > { %345 = sbr.rel (%p342_p3) target bundleno = 2571 (0xa0b), region = 52  ;;  %s2797_s2 = sld [smem:[#allocation8_spill]] (!%p342_p3) }
   0xb   : > { %p1949_p5 = scmp.ne.s32.totalorder (!%p342_p3), %s2348_s27, 0 }
   0xf   : > { %s2445_s10 = scalar_select %p406_p4, %s2348_s27, 3 }
  0x11   : > { %s1990_s11 = sshll.u32 %s2445_s10, 4  ;;  %s1993_s12 = sshll.u32 %s2445_s10, 6 }
  0x12   : > { %s2452_s15 = scalar_lea.vmem %s2796_s1, %s1990_s11  ;;  %s2457_s18 = scalar_lea.vmem %s2797_s2, %s1990_s11 }
  0x13   : > { %s2462_s21 = scalar_lea.vmem %s2788_s3, %s1990_s11  ;;  %s2467_s24 = scalar_lea.vmem %s2789_s4, %s1993_s12 }
  0x14   : > { %s1948_s25 = sshll.u32 %s2445_s10, 3  ;;  %s432_s14 = scalar_lea.vmem %s2791_s6, %s2445_s10 }
  0x15   : > { %s2477_s16 = scalar_lea.vmem %s2790_s5, %s1948_s25  ;;  %s435_s11 = scalar_lea.vmem %s2792_s7, %s2445_s10 }
  0x16   : > { %441 = sbr.rel (%p1949_p5) target bundleno = 34 (0x22), region = 56 }
  0x1b   : > { %v442_v0 = vld [vmem:[%s2785_s0] sm:$0xff]  ;;  %vm444_vm0 = vcmask 261120   ;;  %v443_v1 = vld [vmem:[%s2785_s0 + $0x8] sm:$0xff]  ;;  %v447_v2 = vlaneseq  ;;  %vm453_vm1 = vcmask 64512   ;;  %v2358_v5 = vmov -1e+30  }
  0x1c   : > { %445 = vst.msk [vmem:[#allocation2] sm:$0xff] %vm444_vm0, %v442_v0  ;;  %446 = vst.msk [vmem:[#allocation2 + $0x8] sm:$0xff] %vm444_vm0, %v443_v1 }
  0x1d   : > { %v448_v3 = vshrl.u32 %v447_v2, 7  ;;  %v450_v4 = vand.u32 127, %v447_v2 }
  0x1f   : > { %vm451_vm2 = vcmp.le.s32.totalorder %v450_v4, %v448_v3 }
  0x20   : > { %v452_v6 = vsel %vm451_vm2, 0.0, %v2358_v5 }
  0x21   : > { %454 = vst.msk [vmem:[#allocation3] sm:$0xff] %vm453_vm1, %v452_v6 }
  0x22 PF: > { %vm459_vm3 = vcmask 261120   ;;  %v2248_v21 = vld [vmem:[%s2452_s15 + $0x8] sm:$0xff]   ;;  %v2359_v22 = vmov 0.0   ;;  %vm2360_vm4 = vmmov 0   ;;  %v2249_v23 = vld [vmem:[%s2452_s15] sm:$0xff]   ;;  %v487_v30 = vlaneseq  ;;  %s2361_s30 = smov 88  }
  0x23   : > { %v2490_v7 = vld [vmem:[#allocation2] sm:$0xff]  ;;  %v2492_v8 = vld [vmem:[#allocation2 + $0x8] sm:$0xff]  ;;  %2044 = vmatprep.subr.bf16.mxu0 %v2359_v22  ;;  %2048 = vmatprep.mubr.msk.bf16.mxu0 %vm2360_vm4, %v2359_v22  ;;  %s2362_s15 = smov 96   ;;  %s2363_s23 = smov 120   ;;  %vm571_vm5 = vcmask 64512   ;;  %vm635_vm6 = vcmask 1043456  }
  0x24   : > { %v460_v9 = vsel %vm459_vm3, %v2490_v7, 0.0  ;;  %v463_v10 = vsel %vm459_vm3, %v2492_v8, 0.0  ;;  %2045 = vmatpush3.bf16.msra.mxu0 %v2248_v21  ;;  %2064 = vmatprep.subr.bf16.mxu1 %v2359_v22  ;;  %v2512_v31 = vshrl.u32 %v487_v30, 7  ;;  %v2516_v33 = vld [vmem:[%s2477_s16] sm:$0x3f]  ;;  %s2364_s25 = smov 112  }
  0x25   : > { %461 = vadd.xlane.f32.xlu0 %v460_v9  ;;  %2046 = vmatprep.subr.bf16.mxu0 %v2359_v22  ;;  %v1950_v46 = vld [vmem:[%s432_s14] ss:$0 sm:$0xff]  ;;  %s2365_s26 = smov 80   ;;  %s2366_s13 = smov 104   ;;  %vm1022_vm7 = vcmask 130048   ;;  %vm1024_vm8 = vcmask 195584  }
  0x26   : > { %2066 = vmatprep.mubr.msk.bf16.mxu1 %vm2360_vm4, %v2359_v22  ;;  %v489_v32 = vsub.s32 0, %v2512_v31  ;;  %v495_v37 = vsub.s32 1, %v2512_v31  ;;  %s2367_s14 = smov 72   ;;  %s2368_s16 = smov 56  }
  0x27   : > { %s2369_s17 = smov 64   ;;  %s2370_s19 = smov 48  }
  0x28   : > { %2047 = vmatpush3.bf16.msra.mxu0 %v2249_v23  ;;  %v490_v36 = vrot.slane %v2516_v33, %v489_v32  ;;  %v496_v41 = vrot.slane %v2516_v33, %v495_v37  ;;  %s2371_s12 = smov 40   ;;  %s2372_s20 = smov 8  }
  0x29   : > { %464 = vadd.xlane.f32.xlu0 %v463_v10  ;;  %2052 = vmatprep.subr.bf16.mxu0 %v2359_v22  ;;  %s2373_s22 = smov 16   ;;  %s2374_s1 = smov 24  }
  0x2a   : > { %p1985_p6 = scmp.ne.s32.totalorder %s2348_s27, 3 }
  0xae   : > { %v462_v11 = vpop.xlane.xlu0 %461 }
  0xaf   : > { %v467_v12 = vmul.f32 0.03125, %v462_v11 }
  0xb1   : > { %v469_v13 = vsub.f32 %v2490_v7, %v467_v12 }
  0xb2   : > { %v465_v14 = vpop.xlane.xlu0 %464 }
  0xb3   : > { %v468_v15 = vmul.f32 0.03125, %v465_v14  ;;  %v471_v16 = vmul.f32 %v469_v13, %v469_v13 }
  0xb5   : > { %v470_v17 = vsub.f32 %v2492_v8, %v468_v15  ;;  %v473_v18 = vsel %vm459_vm3, %v471_v16, 0.0  ;;  %v458_v15 = vld [vmem:[#allocation3] sm:$0xff] }
  0xb6   : > { %474 = vadd.xlane.f32.xlu1 %v473_v18 }
  0xb7   : > { %v472_v19 = vmul.f32 %v470_v17, %v470_v17 }
  0xb9   : > { %v476_v20 = vsel %vm459_vm3, %v472_v19, 0.0 }
  0xba   : > { %477 = vadd.xlane.f32.xlu1 %v476_v20 }
 0x13f   : > { %v475_v24 = vpop.xlane.xlu1 %474 }
 0x140   : > { %v479_v25 = vmul.f32 0.03125, %v475_v24 }
 0x142   : > { %v481_v26 = vadd.f32 1e-05, %v479_v25 }
 0x143   : > { %v478_v27 = vpop.xlane.xlu1 %477 }
 0x144   : > { %2262 = vrsqrt.f32 %v481_v26  ;;  %v480_v28 = vmul.f32 0.03125, %v478_v27 }
 0x146   : > { %v482_v29 = vadd.f32 1e-05, %v480_v28 }
 0x148   : > { %2264 = vrsqrt.f32 %v482_v29 }
 0x151   : > { %v2263_v34 = vpop.eup %2262 }
 0x152   : > { %v485_v35 = vmul.f32 %v2263_v34, %v469_v13 }
 0x154   : > { %v491_v40 = vmul.f32 %v490_v36, %v485_v35 }
 0x155   : > { %v2265_v38 = vpop.eup %2264 }
 0x156   : > { %v486_v39 = vmul.f32 %v2265_v38, %v470_v17  ;;  %v497_v43 = vadd.f32 %v496_v41, %v491_v40 }
 0x158   : > { %v492_v42 = vmul.f32 %v490_v36, %v486_v39 }
 0x15a   : > { %v498_v44 = vadd.f32 %v496_v41, %v492_v42 }
 0x15c   : > { %v499_v45 = vpack.c.bf16 %v498_v44, %v497_v43 }
 0x15e   : > { %2049 = vmatmul.mubr.msk.bf16.vlgmr.msra.gmra.mxu0 %vm459_vm3, %v499_v45 }
 0x15f   : > { %2054 = vmatprep.mubr.msk.bf16.mxu0 %vm2360_vm4, %v2359_v22 }
 0x21e   : > { %v560_v47 = vpop.f32.mrf.mxu0 }
 0x21f   : > { %v561_v48 = vadd.f32 %v1950_v46, %v560_v47 }
 0x220   : > { %v2050_v49 = vpop.f32.mrf.mxu0 }
 0x221   : > { %v2529_v50 = vpack.c.bf16 %v561_v48, %v561_v48 }
 0x222   : > { %v563_v51 = vpop.f32.mrf.mxu0 }
 0x223   : > { %681 = vrot.lane.b32.xlu1 %v2529_v50, %s2361_s30  ;;  %569 = vrot.lane.b32.xlu0 %v2529_v50, %s2362_s15  ;;  %v564_v53 = vadd.f32 %v1950_v46, %v563_v51 }
 0x224   : > { %v2051_v52 = vpop.f32.mrf.mxu0 }
 0x225   : > { %v2537_v54 = vpack.c.bf16 %v564_v53, %v564_v53 }
 0x227   : > { %679 = vrot.lane.b32.xlu1 %v2529_v50, %s2363_s23  ;;  %789 = vrot.lane.b32.xlu0 %v2529_v50, %s2364_s25 }
 0x22b   : > { %791 = vrot.lane.b32.xlu1 %v2529_v50, %s2365_s26  ;;  %899 = vrot.lane.b32.xlu0 %v2529_v50, %s2366_s13 }
 0x22f   : > { %901 = vrot.lane.b32.xlu1 %v2529_v50, %s2367_s14  ;;  %1138 = vrot.lane.b32.xlu0 %v2537_v54, %s2361_s30 }
 0x233   : > { %1248 = vrot.lane.b32.xlu0 %v2537_v54, %s2365_s26  ;;  %1028 = vrot.lane.b32.xlu1 %v2537_v54, %s2362_s15 }
 0x237   : > { %1358 = vrot.lane.b32.xlu0 %v2537_v54, %s2367_s14  ;;  %1136 = vrot.lane.b32.xlu1 %v2537_v54, %s2363_s23 }
 0x23b   : > { %1246 = vrot.lane.b32.xlu1 %v2537_v54, %s2364_s25 }
 0x23f   : > { %1356 = vrot.lane.b32.xlu1 %v2537_v54, %s2366_s13 }
 0x295   : > { %v682_v55 = vpop.permute.xlu1 %681  ;;  %v570_v56 = vpop.permute.xlu0 %569 }
 0x296   : > { %v576_v57 = vsel %vm571_vm5, %v570_v56, 0  ;;  %v687_v58 = vsel %vm571_vm5, %v682_v55, 0 }
 0x297   : > { %2053 = vmatpush3.bf16.xpose.msra.mxu0 %v576_v57  ;;  %2065 = vmatpush3.bf16.xpose.msra.mxu1 %v687_v58 }
 0x298   : > { %2076 = vmatprep.subr.bf16.mxu1 %v2359_v22  ;;  %2058 = vmatprep.subr.bf16.mxu0 %v2359_v22 }
 0x299   : > { %v680_v59 = vpop.permute.xlu1 %679  ;;  %v790_v63 = vpop.permute.xlu0 %789 }
 0x29d   : > { %v792_v60 = vpop.permute.xlu1 %791  ;;  %v900_v2 = vpop.permute.xlu0 %899 }
 0x29e   : > { %v797_v61 = vsel %vm571_vm5, %v792_v60, 0  ;;  %2055 = vmatmul.mubr.msk.bf16.vlgmr.msra.gmra.mxu0 %vm571_vm5, %v2529_v50  ;;  %2067 = vmatmul.mubr.msk.bf16.vlgmr.msra.gmra.mxu1 %vm571_vm5, %v680_v59 }
 0x29f   : > { %2077 = vmatpush3.bf16.xpose.msra.mxu1 %v797_v61  ;;  %2078 = vmatprep.mubr.msk.bf16.mxu1 %vm2360_vm4, %v2359_v22 }
 0x2a0   : > { %2088 = vmatprep.subr.bf16.mxu1 %v2359_v22  ;;  %2060 = vmatprep.mubr.msk.bf16.mxu0 %vm2360_vm4, %v2359_v22 }
 0x2a1   : > { %v902_v62 = vpop.permute.xlu1 %901  ;;  %v1139_v4 = vpop.permute.xlu0 %1138 }
 0x2a2   : > { %v907_v0 = vsel %vm571_vm5, %v902_v62, 0  ;;  %v1144_v5 = vsel %vm571_vm5, %v1139_v4, 0 }
 0x2a5   : > { %v1029_v1 = vpop.permute.xlu1 %1028  ;;  %v1249_v6 = vpop.permute.xlu0 %1248 }
 0x2a6   : > { %2079 = vmatmul.mubr.msk.bf16.vlgmr.msra.gmra.mxu1 %vm571_vm5, %v790_v63  ;;  %v1034_v3 = vsel %vm571_vm5, %v1029_v1, 0  ;;  %v1254_v10 = vsel %vm571_vm5, %v1249_v6, 0 }
 0x2a7   : > { %2089 = vmatpush3.bf16.xpose.msra.mxu1 %v907_v0  ;;  %2090 = vmatprep.mubr.msk.bf16.mxu1 %vm2360_vm4, %v2359_v22 }
 0x2a8   : > { %2100 = vmatprep.subr.bf16.mxu1 %v2359_v22 }
 0x2a9   : > { %v1137_v9 = vpop.permute.xlu1 %1136  ;;  %v1359_v11 = vpop.permute.xlu0 %1358 }
 0x2aa   : > { %v1364_v13 = vsel %vm571_vm5, %v1359_v11, 0 }
 0x2ad   : > { %v1247_v12 = vpop.permute.xlu1 %1246 }
 0x2ae   : > { %2091 = vmatmul.mubr.msk.bf16.vlgmr.msra.gmra.mxu1 %vm571_vm5, %v900_v2 }
 0x2af   : > { %2101 = vmatpush3.bf16.xpose.msra.mxu1 %v1034_v3  ;;  %2102 = vmatprep.mubr.msk.bf16.mxu1 %vm2360_vm4, %v2359_v22 }
 0x2b0   : > { %2112 = vmatprep.subr.bf16.mxu1 %v2359_v22 }
 0x2b1   : > { %v1357_v14 = vpop.permute.xlu1 %1356 }
 0x2b6   : > { %2103 = vmatmul.mubr.msk.bf16.vlgmr.msra.gmra.mxu1 %vm571_vm5, %v2537_v54 }
 0x2b7   : > { %2113 = vmatpush3.bf16.xpose.msra.mxu1 %v1144_v5  ;;  %2114 = vmatprep.mubr.msk.bf16.mxu1 %vm2360_vm4, %v2359_v22 }
 0x2b8   : > { %2124 = vmatprep.subr.bf16.mxu1 %v2359_v22 }
 0x2be   : > { %2115 = vmatmul.mubr.msk.bf16.vlgmr.msra.gmra.mxu1 %vm571_vm5, %v1137_v9 }
 0x2bf   : > { %2125 = vmatpush3.bf16.xpose.msra.mxu1 %v1254_v10  ;;  %2126 = vmatprep.mubr.msk.bf16.mxu1 %vm2360_vm4, %v2359_v22 }
 0x2c0   : > { %2136 = vmatprep.subr.bf16.mxu1 %v2359_v22 }
 0x2c6   : > { %2127 = vmatmul.mubr.msk.bf16.vlgmr.msra.gmra.mxu1 %vm571_vm5, %v1247_v12 }
 0x2c7   : > { %2137 = vmatpush3.bf16.xpose.msra.mxu1 %v1364_v13  ;;  %2138 = vmatprep.mubr.msk.bf16.mxu1 %vm2360_vm4, %v2359_v22 }
 0x2c8   : > { %2148 = vmatprep.subr.bf16.mxu1 %v2359_v22 }
 0x2ce   : > { %2139 = vmatmul.mubr.msk.bf16.vlgmr.msra.gmra.mxu1 %vm571_vm5, %v1357_v14 }
 0x2cf   : > { %2152 = vmatprep.mubr.msk.bf16.mxu1 %vm2360_vm4, %v2359_v22 }
 0x35e   : > { %v612_v16 = vpop.f32.mrf.mxu0  ;;  %v723_v17 = vpop.f32.mrf.mxu1 }
 0x35f   : > { %v2589_v18 = vadd.f32 %v612_v16, %v458_v15  ;;  %v2591_v19 = vadd.f32 %v723_v17, %v458_v15 }
 0x360   : > { %v2056_v20 = vpop.f32.mrf.mxu0  ;;  %v2068_v21 = vpop.f32.mrf.mxu1 }
 0x361   : > { %v729_v23 = vsel %vm571_vm5, %v2591_v19, -inf  ;;  %v618_v24 = vsel %vm571_vm5, %v2589_v18, -inf }
 0x362   : > { %v726_v25 = vpop.f32.mrf.mxu1  ;;  %730 = vmax.xlane.f32.xlu1 %v729_v23  ;;  %619 = vmax.xlane.f32.xlu0 %v618_v24  ;;  %v615_v26 = vpop.f32.mrf.mxu0 }
 0x364   : > { %v2057_v27 = vpop.f32.mrf.mxu0  ;;  %v2069_v28 = vpop.f32.mrf.mxu1 }
 0x366   : > { %v833_v29 = vpop.f32.mrf.mxu1 }
 0x367   : > { %v834_v55 = vadd.f32 %v833_v29, %v458_v15 }
 0x368   : > { %v2080_v30 = vpop.f32.mrf.mxu1 }
 0x369   : > { %v839_v62 = vsel %vm571_vm5, %v834_v55, -inf }
 0x36a   : > { %v836_v32 = vpop.f32.mrf.mxu1 }
 0x36c   : > { %v2081_v34 = vpop.f32.mrf.mxu1 }
 0x36e   : > { %v943_v35 = vpop.f32.mrf.mxu1 }
 0x36f   : > { %v944_v59 = vadd.f32 %v943_v35, %v458_v15 }
 0x370   : > { %v2092_v36 = vpop.f32.mrf.mxu1 }
 0x371   : > { %v949_v1 = vsel %vm571_vm5, %v944_v59, -inf }
 0x372   : > { %v946_v37 = vpop.f32.mrf.mxu1 }
 0x373   : > { %741 = vrot.lane.b32.xlu1 %v2529_v50, %s2368_s16 }
 0x374   : > { %v2093_v38 = vpop.f32.mrf.mxu1 }
 0x376   : > { %v1070_v39 = vpop.f32.mrf.mxu1 }
 0x377   : > { %v1071_v63 = vadd.f32 %v1070_v39, %v458_v15 }
 0x378   : > { %v2104_v40 = vpop.f32.mrf.mxu1  ;;  %630 = vrot.lane.b32.xlu0 %v2529_v50, %s2369_s17 }
 0x379   : > { %v1076_v3 = vsel %vm571_vm5, %v1071_v63, -inf }
 0x37a   : > { %v1073_v41 = vpop.f32.mrf.mxu1 }
 0x37c   : > { %v2105_v42 = vpop.f32.mrf.mxu1 }
 0x37e   : > { %v1180_v43 = vpop.f32.mrf.mxu1 }
 0x37f   : > { %v1181_v56 = vadd.f32 %v1180_v43, %v458_v15 }
 0x380   : > { %v2116_v44 = vpop.f32.mrf.mxu1 }
 0x381   : > { %v1186_v61 = vsel %vm571_vm5, %v1181_v56, -inf }
 0x382   : > { %v1183_v45 = vpop.f32.mrf.mxu1 }
 0x384   : > { %v2117_v46 = vpop.f32.mrf.mxu1 }
 0x386   : > { %v1290_v47 = vpop.f32.mrf.mxu1 }
 0x387   : > { %v1291_v2 = vadd.f32 %v1290_v47, %v458_v15 }
 0x388   : > { %v2128_v48 = vpop.f32.mrf.mxu1 }
 0x389   : > { %v1296_v4 = vsel %vm571_vm5, %v1291_v2, -inf }
 0x38a   : > { %v1293_v49 = vpop.f32.mrf.mxu1 }
 0x38c   : > { %v2129_v51 = vpop.f32.mrf.mxu1 }
 0x38e   : > { %v1400_v52 = vpop.f32.mrf.mxu1 }
 0x38f   : > { %v2601_v60 = vadd.f32 %v1400_v52, %v458_v15 }
 0x390   : > { %v2140_v53 = vpop.f32.mrf.mxu1 }
 0x391   : > { %v1406_v0 = vsel %vm571_vm5, %v2601_v60, -inf }
 0x392   : > { %v1403_v57 = vpop.f32.mrf.mxu1 }
 0x394   : > { %v2141_v58 = vpop.f32.mrf.mxu1 }
 0x397   : > { %1187 = vmax.xlane.f32.xlu1 %v1186_v61  ;;  %840 = vmax.xlane.f32.xlu0 %v839_v62 }
 0x39b   : > { %1407 = vmax.xlane.f32.xlu1 %v1406_v0  ;;  %950 = vmax.xlane.f32.xlu0 %v949_v1 }
 0x39f   : > { %1077 = vmax.xlane.f32.xlu0 %v1076_v3 }
 0x3a3   : > { %1297 = vmax.xlane.f32.xlu0 %v1296_v4 }
 0x3b9   : > { %851 = vrot.lane.b32.xlu0 %v2529_v50, %s2370_s19 }
 0x3eb   : > { %v731_v5 = vpop.xlane.xlu1 %730  ;;  %v620_v6 = vpop.xlane.xlu0 %619 }
 0x3ec   : > { %v732_v9 = vsub.f32 %v2591_v19, %v731_v5  ;;  %v621_v10 = vsub.f32 %v2589_v18, %v620_v6 }
 0x3ee   : > { %v733_v11 = vmul.f32 1.442695, %v732_v9  ;;  %v622_v12 = vmul.f32 1.442695, %v621_v10 }
 0x3ef   : > { %v631_v13 = vpop.permute.xlu0 %630  ;;  %v742_v20 = vpop.permute.xlu1 %741 }
 0x3f0   : > { %2266 = vpow2.f32 %v733_v11  ;;  %v637_v14 = vsel %vm635_vm6, %v631_v13, 0  ;;  %v747_v61 = vsel %vm635_vm6, %v742_v20, 0 }
 0x3f1   : > { %2268 = vpow2.f32 %v622_v12  ;;  %2059 = vmatpush3.bf16.msra.mxu0 %v637_v14 }
 0x3f2   : > { %2070 = vmatprep.subr.bf16.mxu0 %v2359_v22 }
 0x3fd   : > { %v2616_v15 = vpop.eup %2266 }
 0x3fe   : > { %v2269_v16 = vpop.eup %2268  ;;  %v735_v17 = vsel %vm571_vm5, %v2616_v15, 0.0 }
 0x3ff   : > { %736 = vadd.xlane.f32.xlu1 %v735_v17  ;;  %v624_v18 = vsel %vm571_vm5, %v2269_v16, 0.0 }
 0x400   : > { %625 = vadd.xlane.f32.xlu0 %v624_v18 }
 0x410   : > { %1088 = vrot.lane.b32.xlu1 %v2537_v54, %s2369_s17 }
 0x420   : > { %v841_v19 = vpop.xlane.xlu0 %840  ;;  %v1188_v25 = vpop.xlane.xlu1 %1187 }
 0x421   : > { %v842_v21 = vsub.f32 %v834_v55, %v841_v19  ;;  %v1189_v28 = vsub.f32 %v1181_v56, %v1188_v25 }
 0x423   : > { %v843_v23 = vmul.f32 1.442695, %v842_v21  ;;  %v1190_v34 = vmul.f32 1.442695, %v1189_v28 }
 0x424   : > { %v951_v24 = vpop.xlane.xlu0 %950  ;;  %v1408_v46 = vpop.xlane.xlu1 %1407 }
 0x425   : > { %v952_v26 = vsub.f32 %v944_v59, %v951_v24  ;;  %2270 = vpow2.f32 %v843_v23  ;;  %v1409_v47 = vsub.f32 %v2601_v60, %v1408_v46 }
 0x427   : > { %v953_v27 = vmul.f32 1.442695, %v952_v26  ;;  %v1410_v48 = vmul.f32 1.442695, %v1409_v47 }
 0x428   : > { %v1078_v29 = vpop.xlane.xlu0 %1077 }
 0x429   : > { %v1079_v30 = vsub.f32 %v1071_v63, %v1078_v29  ;;  %2272 = vpow2.f32 %v953_v27 }
 0x42b   : > { %v1080_v32 = vmul.f32 1.442695, %v1079_v30 }
 0x42c   : > { %v1298_v43 = vpop.xlane.xlu0 %1297 }
 0x42d   : > { %2274 = vpow2.f32 %v1080_v32  ;;  %v1299_v44 = vsub.f32 %v1291_v2, %v1298_v43 }
 0x42e   : > { %2276 = vpow2.f32 %v1190_v34 }
 0x42f   : > { %v1300_v45 = vmul.f32 1.442695, %v1299_v44 }
 0x430   : > { %v852_v53 = vpop.permute.xlu0 %851 }
 0x431   : > { %2278 = vpow2.f32 %v1300_v45  ;;  %v857_v63 = vsel %vm635_vm6, %v852_v53, 0 }
 0x432   : > { %v2271_v35 = vpop.eup %2270  ;;  %2280 = vpow2.f32 %v1410_v48 }
 0x433   : > { %v845_v36 = vsel %vm571_vm5, %v2271_v35, 0.0 }
 0x434   : > { %846 = vadd.xlane.f32.xlu0 %v845_v36 }
 0x436   : > { %v2624_v37 = vpop.eup %2272 }
 0x437   : > { %v955_v38 = vsel %vm571_vm5, %v2624_v37, 0.0 }
 0x438   : > { %956 = vadd.xlane.f32.xlu1 %v955_v38 }
 0x43a   : > { %v2628_v39 = vpop.eup %2274 }
 0x43b   : > { %v1082_v40 = vsel %vm571_vm5, %v2628_v39, 0.0  ;;  %v2632_v41 = vpop.eup %2276 }
 0x43c   : > { %1083 = vadd.xlane.f32.xlu1 %v1082_v40  ;;  %v1192_v42 = vsel %vm571_vm5, %v2632_v41, 0.0 }
 0x43e   : > { %v2640_v49 = vpop.eup %2278 }
 0x43f   : > { %v1302_v51 = vsel %vm571_vm5, %v2640_v49, 0.0  ;;  %v2644_v52 = vpop.eup %2280 }
 0x440   : > { %1193 = vadd.xlane.f32.xlu1 %v1192_v42 }
 0x44a   : > { %961 = vrot.lane.b32.xlu0 %v2529_v50, %s2371_s12  ;;  %v1412_v50 = vsel %vm571_vm5, %v2644_v52, 0.0 }
 0x451   : > { %1198 = vrot.lane.b32.xlu1 %v2537_v54, %s2368_s16 }
 0x469   : > { %1303 = vadd.xlane.f32.xlu0 %v1302_v51 }
 0x475   : > { %1413 = vadd.xlane.f32.xlu1 %v1412_v50 }
 0x47f   : > { %1308 = vrot.lane.b32.xlu0 %v2537_v54, %s2370_s19 }
 0x486   : > { %1418 = vrot.lane.b32.xlu1 %v2537_v54, %s2371_s12 }
 0x488   : > { %v737_v56 = vpop.xlane.xlu1 %736 }
 0x489   : > { %v626_v55 = vpop.xlane.xlu0 %625 }
 0x48a   : > { %2282 = vrcp.f32 %v626_v55 }
 0x48b   : > { %2284 = vrcp.f32 %v737_v56 }
 0x48c   : > { %v1089_v0 = vpop.permute.xlu1 %1088 }
 0x497   : > { %v2283_v57 = vpop.eup %2282 }
 0x498   : > { %v628_v58 = vmul.f32 %v2283_v57, %v2269_v16  ;;  %v2285_v60 = vpop.eup %2284  ;;  %v1094_v16 = vsel %vm635_vm6, %v1089_v0, 0  ;;  %v2250_v0 = vld [vmem:[%s2457_s18 + $0x8] sm:$0xff]  }
 0x499   : > { %v739_v54 = vmul.f32 %v2285_v60, %v2616_v15  ;;  %2149 = vmatpush3.bf16.msra.mxu1 %v2250_v0 }
 0x49a   : > { %v629_v59 = vpack.c.bf16 %v628_v58, %v628_v58  ;;  %2150 = vmatprep.subr.bf16.mxu1 %v2359_v22 }
 0x49b   : > { %v740_v62 = vpack.c.bf16 %v739_v54, %v739_v54 }
 0x49c   : > { %2061 = vmatmul.mubr.msk.bf16.vlgmr.msra.gmra.mxu0 %vm571_vm5, %v629_v59 }
 0x49d   : > { %2071 = vmatpush3.bf16.msra.mxu0 %v747_v61  ;;  %2072 = vmatprep.mubr.msk.bf16.mxu0 %vm2360_vm4, %v2359_v22 }
 0x49e   : > { %2082 = vmatprep.subr.bf16.mxu0 %v2359_v22 }
 0x4a4   : > { %2073 = vmatmul.mubr.msk.bf16.vlgmr.msra.gmra.mxu0 %vm571_vm5, %v740_v62 }
 0x4a5   : > { %2083 = vmatpush3.bf16.msra.mxu0 %v857_v63  ;;  %2084 = vmatprep.mubr.msk.bf16.mxu0 %vm2360_vm4, %v2359_v22 }
 0x4a6   : > { %2094 = vmatprep.subr.bf16.mxu0 %v2359_v22 }
 0x4bd   : > { %v847_v1 = vpop.xlane.xlu0 %846 }
 0x4be   : > { %2286 = vrcp.f32 %v847_v1 }
 0x4c1   : > { %v957_v2 = vpop.xlane.xlu1 %956  ;;  %v962_v6 = vpop.permute.xlu0 %961 }
 0x4c2   : > { %2288 = vrcp.f32 %v957_v2  ;;  %v967_v12 = vsel %vm635_vm6, %v962_v6, 0 }
 0x4c5   : > { %v1084_v3 = vpop.xlane.xlu1 %1083 }
 0x4c6   : > { %2290 = vrcp.f32 %v1084_v3 }
 0x4c9   : > { %v1194_v11 = vpop.xlane.xlu1 %1193 }
 0x4ca   : > { %2292 = vrcp.f32 %v1194_v11 }
 0x4cb   : > { %v2287_v4 = vpop.eup %2286 }
 0x4cc   : > { %v849_v5 = vmul.f32 %v2287_v4, %v2271_v35  ;;  %v2251_v4 = vld [vmem:[%s2457_s18] sm:$0xff]  }
 0x4cd   : > { %v1199_v18 = vpop.permute.xlu1 %1198  ;;  %2151 = vmatpush3.bf16.msra.mxu1 %v2251_v4 }
 0x4ce   : > { %v850_v9 = vpack.c.bf16 %v849_v5, %v849_v5  ;;  %v1204_v21 = vsel %vm635_vm6, %v1199_v18, 0  ;;  %2164 = vmatprep.subr.bf16.mxu1 %v2359_v22 }
 0x4cf   : > { %v2289_v10 = vpop.eup %2288 }
 0x4d0   : > { %2085 = vmatmul.mubr.msk.bf16.vlgmr.msra.gmra.mxu0 %vm571_vm5, %v850_v9  ;;  %v959_v13 = vmul.f32 %v2289_v10, %v2624_v37 }
 0x4d1   : > { %2095 = vmatpush3.bf16.msra.mxu0 %v967_v12  ;;  %2096 = vmatprep.mubr.msk.bf16.mxu0 %vm2360_vm4, %v2359_v22 }
 0x4d2   : > { %2106 = vmatprep.subr.bf16.mxu0 %v2359_v22  ;;  %v960_v14 = vpack.c.bf16 %v959_v13, %v959_v13 }
 0x4d3   : > { %v2291_v15 = vpop.eup %2290 }
 0x4d4   : > { %v1086_v17 = vmul.f32 %v2291_v15, %v2628_v39 }
 0x4d6   : > { %v1087_v19 = vpack.c.bf16 %v1086_v17, %v1086_v17 }
 0x4d7   : > { %v2293_v20 = vpop.eup %2292 }
 0x4d8   : > { %2097 = vmatmul.mubr.msk.bf16.vlgmr.msra.gmra.mxu0 %vm571_vm5, %v960_v14  ;;  %v1196_v23 = vmul.f32 %v2293_v20, %v2632_v41 }
 0x4d9   : > { %2107 = vmatpush3.bf16.msra.mxu0 %v1094_v16  ;;  %2108 = vmatprep.mubr.msk.bf16.mxu0 %vm2360_vm4, %v2359_v22 }
 0x4da   : > { %2118 = vmatprep.subr.bf16.mxu0 %v2359_v22  ;;  %v1197_v24 = vpack.c.bf16 %v1196_v23, %v1196_v23 }
 0x4e0   : > { %2109 = vmatmul.mubr.msk.bf16.vlgmr.msra.gmra.mxu0 %vm571_vm5, %v1087_v19 }
 0x4e1   : > { %2119 = vmatpush3.bf16.msra.mxu0 %v1204_v21  ;;  %2120 = vmatprep.mubr.msk.bf16.mxu0 %vm2360_vm4, %v2359_v22 }
 0x4e2   : > { %2130 = vmatprep.subr.bf16.mxu0 %v2359_v22 }
 0x4e8   : > { %2121 = vmatmul.mubr.msk.bf16.vlgmr.msra.gmra.mxu0 %vm571_vm5, %v1197_v24 }
 0x4e9   : > { %2132 = vmatprep.mubr.msk.bf16.mxu0 %vm2360_vm4, %v2359_v22 }
 0x4f2   : > { %v1304_v25 = vpop.xlane.xlu0 %1303 }
 0x4f3   : > { %2294 = vrcp.f32 %v1304_v25 }
 0x4f6   : > { %v1309_v26 = vpop.permute.xlu0 %1308 }
 0x4f7   : > { %v1314_v27 = vsel %vm635_vm6, %v1309_v26, 0 }
 0x4f8   : > { %2131 = vmatpush3.bf16.msra.mxu0 %v1314_v27 }
 0x4f9   : > { %2142 = vmatprep.subr.bf16.mxu0 %v2359_v22 }
 0x4fe   : > { %v1414_v28 = vpop.xlane.xlu1 %1413 }
 0x4ff   : > { %2296 = vrcp.f32 %v1414_v28 }
 0x500   : > { %v2295_v29 = vpop.eup %2294 }
 0x501   : > { %v1306_v30 = vmul.f32 %v2295_v29, %v2640_v49 }
 0x502   : > { %v1419_v32 = vpop.permute.xlu1 %1418 }
 0x503   : > { %v1424_v34 = vsel %vm635_vm6, %v1419_v32, 0  ;;  %v1307_v35 = vpack.c.bf16 %v1306_v30, %v1306_v30  ;;  %v1488_v32 = vsub.s32 4, %v2512_v31 }
 0x505   : > { %2133 = vmatmul.mubr.msk.bf16.vlgmr.msra.gmra.mxu0 %vm571_vm5, %v1307_v35 }
 0x506   : > { %2143 = vmatpush3.bf16.msra.mxu0 %v1424_v34  ;;  %2144 = vmatprep.mubr.msk.bf16.mxu0 %vm2360_vm4, %v2359_v22  ;;  %v1489_v34 = vrot.slane %v2516_v33, %v1488_v32 }
 0x507   : > { %2156 = vmatprep.subr.bf16.mxu0 %v2359_v22 }
 0x50c   : > { %v2297_v36 = vpop.eup %2296 }
 0x50d   : > { %v1416_v37 = vmul.f32 %v2297_v36, %v2644_v52 }
 0x50f   : > { %v1417_v38 = vpack.c.bf16 %v1416_v37, %v1416_v37 }
 0x511   : > { %2145 = vmatmul.mubr.msk.bf16.vlgmr.msra.gmra.mxu0 %vm571_vm5, %v1417_v38 }
 0x512   : > { %2160 = vmatprep.mubr.msk.bf16.mxu0 %vm2360_vm4, %v2359_v22 }
 0x55c   : > { %v673_v39 = vpop.f32.mrf.mxu0 }
 0x55e   : > { %v2062_v40 = vpop.f32.mrf.mxu0 }
 0x560   : > { %v676_v41 = vpop.f32.mrf.mxu0 }
 0x562   : > { %v2063_v42 = vpop.f32.mrf.mxu0 }
 0x564   : > { %v783_v43 = vpop.f32.mrf.mxu0 }
 0x566   : > { %v2074_v44 = vpop.f32.mrf.mxu0 }
 0x568   : > { %v786_v45 = vpop.f32.mrf.mxu0 }
 0x56a   : > { %v2075_v46 = vpop.f32.mrf.mxu0 }
 0x590   : > { %v893_v47 = vpop.f32.mrf.mxu0 }
 0x592   : > { %v2086_v48 = vpop.f32.mrf.mxu0 }
 0x594   : > { %v896_v49 = vpop.f32.mrf.mxu0 }
 0x596   : > { %v2087_v51 = vpop.f32.mrf.mxu0 }
 0x598   : > { %v1003_v52 = vpop.f32.mrf.mxu0 }
 0x59a   : > { %v2098_v50 = vpop.f32.mrf.mxu0 }
 0x59c   : > { %v1006_v53 = vpop.f32.mrf.mxu0 }
 0x59d   : > { %v2252_v53 = vld [vmem:[%s2462_s21 + $0x8] sm:$0xff]  }
 0x59e   : > { %v2099_v55 = vpop.f32.mrf.mxu0  ;;  %2157 = vmatpush3.bf16.msra.mxu0 %v2252_v53 }
 0x59f   : > { %v2253_v55 = vld [vmem:[%s2462_s21] sm:$0xff]   ;;  %2158 = vmatprep.subr.bf16.mxu0 %v2359_v22 }
 0x5a0   : > { %v1130_v56 = vpop.f32.mrf.mxu0 }
 0x5a2   : > { %v2110_v57 = vpop.f32.mrf.mxu0  ;;  %2159 = vmatpush3.bf16.msra.mxu0 %v2253_v55 }
 0x5a4   : > { %v1133_v58 = vpop.f32.mrf.mxu0 }
 0x5a6   : > { %v2111_v59 = vpop.f32.mrf.mxu0 }
 0x5a8   : > { %v1240_v60 = vpop.f32.mrf.mxu0 }
 0x5a9   : > { %v2233_v61 = vpack.i.bf16 %v1240_v60, %v783_v43 }
 0x5aa   : > { %v2122_v54 = vpop.f32.mrf.mxu0 }
 0x5ab   : > { %2234 = vrot.lane.b32.xlu0 %v2233_v61, %s2372_s20  ;;  %v1576_v54 = vsub.s32 2, %v2512_v31 }
 0x5ac   : > { %v1243_v62 = vpop.f32.mrf.mxu0 }
 0x5ad   : > { %v1577_v0 = vrot.slane %v2516_v33, %v1576_v54 }
 0x5ae   : > { %v2123_v63 = vpop.f32.mrf.mxu0 }
 0x5c5   : > { %v1350_v1 = vpop.f32.mrf.mxu0 }
 0x5c6   : > { %v2238_v2 = vpack.i.bf16 %v1350_v1, %v893_v47  ;;  %v1582_v1 = vsub.s32 3, %v2512_v31 }
 0x5c7   : > { %v2134_v3 = vpop.f32.mrf.mxu0 }
 0x5c8   : > { %2239 = vrot.lane.b32.xlu1 %v2238_v2, %s2373_s22 }
 0x5c9   : > { %v1353_v5 = vpop.f32.mrf.mxu0 }
 0x5ca   : > { %v1583_v5 = vrot.slane %v2516_v33, %v1582_v1 }
 0x5cb   : > { %v2135_v6 = vpop.f32.mrf.mxu0 }
 0x5d1   : > { %v1460_v9 = vpop.f32.mrf.mxu0 }
 0x5d2   : > { %v2243_v10 = vpack.i.bf16 %v1460_v9, %v1003_v52 }
 0x5d3   : > { %v2146_v11 = vpop.f32.mrf.mxu0 }
 0x5d4   : > { %2244 = vrot.lane.b32.xlu0 %v2243_v10, %s2374_s1 }
 0x5d5   : > { %v1463_v12 = vpop.f32.mrf.mxu0 }
 0x5d6   : > { %v2254_v12 = vld [vmem:[%s2467_s24 + $0x38] sm:$0xff]  }
 0x5d7   : > { %v2147_v13 = vpop.f32.mrf.mxu0 }
 0x5d8   : > { %v2255_v13 = vld [vmem:[%s2467_s24 + $0x30] sm:$0xff]  }
 0x61d   : > { %v2235_v14 = vpop.permute.xlu0 %2234 }
 0x61e   : > { %v2237_v16 = vunpack.i.h.bf16 %v2235_v14  ;;  %v2236_v17 = vunpack.i.l.bf16 %v2235_v14  ;;  %v2256_v14 = vld [vmem:[%s2467_s24 + $0x28] sm:$0xff]  }
 0x620   : > { %v1478_v21 = vsel %vm571_vm5, %v1130_v56, %v2237_v16  ;;  %v1021_v23 = vsel %vm571_vm5, %v673_v39, %v2236_v17  ;;  %v2258_v16 = vld [vmem:[%s2467_s24 + $0x18] sm:$0xff]   ;;  %v2259_v17 = vld [vmem:[%s2467_s24 + $0x10] sm:$0xff]  }
 0x63a   : > { %v2240_v15 = vpop.permute.xlu1 %2239 }
 0x63b   : > { %v2242_v18 = vunpack.i.h.bf16 %v2240_v15  ;;  %v2241_v19 = vunpack.i.l.bf16 %v2240_v15  ;;  %v2257_v15 = vld [vmem:[%s2467_s24 + $0x20] sm:$0xff]  }
 0x63d   : > { %v1479_v26 = vsel %vm1022_vm7, %v1478_v21, %v2242_v18  ;;  %v1023_v27 = vsel %vm1022_vm7, %v1021_v23, %v2241_v19  ;;  %v2260_v18 = vld [vmem:[%s2467_s24 + $0x8] sm:$0xff]   ;;  %v2261_v19 = vld [vmem:[%s2467_s24] sm:$0xff]  }
 0x646   : > { %v2245_v20 = vpop.permute.xlu0 %2244 }
 0x647   : > { %v2247_v24 = vunpack.i.h.bf16 %v2245_v20  ;;  %v2246_v25 = vunpack.i.l.bf16 %v2245_v20  ;;  %v1973_v20 = vld [vmem:[%s435_s11] ss:$0 sm:$0xff] }
 0x649   : > { %v1480_v28 = vsel %vm1024_vm8, %v1479_v26, %v2247_v24  ;;  %v1025_v29 = vsel %vm1024_vm8, %v1023_v27, %v2246_v25 }
 0x64a   : > { %v1481_v30 = vpack.c.bf16 %v1480_v28, %v1025_v29 }
 0x64c   : > { %2153 = vmatmul.mubr.msk.bf16.vlgmr.msra.gmra.mxu1 %vm459_vm3, %v1481_v30 }
 0x64d   : > { %2180 = vmatprep.mubr.msk.bf16.mxu1 %vm2360_vm4, %v2359_v22  ;;  %2165 = vmatpush3.bf16.msra.mxu1 %v2254_v12 }
 0x64e   : > { %2166 = vmatprep.subr.bf16.mxu1 %v2359_v22 }
 0x651   : > { %2167 = vmatpush3.bf16.msra.mxu1 %v2255_v13 }
 0x652   : > { %2168 = vmatprep.subr.bf16.mxu1 %v2359_v22 }
 0x655   : > { %2169 = vmatpush3.bf16.msra.mxu1 %v2256_v14 }
 0x656   : > { %2170 = vmatprep.subr.bf16.mxu1 %v2359_v22 }
 0x659   : > { %2171 = vmatpush3.bf16.msra.mxu1 %v2257_v15 }
 0x65a   : > { %2172 = vmatprep.subr.bf16.mxu1 %v2359_v22 }
 0x65d   : > { %2173 = vmatpush3.bf16.msra.mxu1 %v2258_v16 }
 0x65e   : > { %2174 = vmatprep.subr.bf16.mxu1 %v2359_v22 }
 0x661   : > { %2175 = vmatpush3.bf16.msra.mxu1 %v2259_v17 }
 0x662   : > { %2176 = vmatprep.subr.bf16.mxu1 %v2359_v22 }
 0x665   : > { %2177 = vmatpush3.bf16.msra.mxu1 %v2260_v18 }
 0x666   : > { %2178 = vmatprep.subr.bf16.mxu1 %v2359_v22 }
 0x669   : > { %2179 = vmatpush3.bf16.msra.mxu1 %v2261_v19 }
 0x70c   : > { %v1539_v35 = vpop.f32.mrf.mxu1 }
 0x70d   : > { %v1540_v36 = vadd.f32 %v1539_v35, %v1489_v34 }
 0x70e   : > { %v2154_v37 = vpop.f32.mrf.mxu1 }
 0x70f   : > { %v2708_v38 = vadd.f32 %v1540_v36, %v2490_v7 }
 0x710   : > { %v1542_v39 = vpop.f32.mrf.mxu1 }
 0x711   : > { %v1543_v40 = vadd.f32 %v1542_v39, %v1489_v34  ;;  %v1548_v41 = vsel %vm459_vm3, %v2708_v38, 0.0 }
 0x712   : > { %1549 = vadd.xlane.f32.xlu1 %v1548_v41  ;;  %v2155_v42 = vpop.f32.mrf.mxu1 }
 0x713   : > { %v2713_v43 = vadd.f32 %v1543_v40, %v2492_v8 }
 0x715   : > { %v1551_v44 = vsel %vm459_vm3, %v2713_v43, 0.0 }
 0x716   : > { %1552 = vadd.xlane.f32.xlu0 %v1551_v44 }
 0x79b   : > { %v1550_v45 = vpop.xlane.xlu1 %1549 }
 0x79c   : > { %v1554_v46 = vmul.f32 0.03125, %v1550_v45 }
 0x79e   : > { %v1556_v7 = vsub.f32 %v2708_v38, %v1554_v46 }
 0x79f   : > { %v1553_v47 = vpop.xlane.xlu0 %1552 }
 0x7a0   : > { %v1555_v48 = vmul.f32 0.03125, %v1553_v47  ;;  %v1558_v49 = vmul.f32 %v1556_v7, %v1556_v7 }
 0x7a2   : > { %v1557_v51 = vsub.f32 %v2713_v43, %v1555_v48  ;;  %v1560_v52 = vsel %vm459_vm3, %v1558_v49, 0.0  ;;  %v1691_v49 = vsub.s32 5, %v2512_v31 }
 0x7a3   : > { %1561 = vadd.xlane.f32.xlu0 %v1560_v52 }
 0x7a4   : > { %v1559_v50 = vmul.f32 %v1557_v51, %v1557_v51 }
 0x7a6   : > { %v1563_v8 = vsel %vm459_vm3, %v1559_v50, 0.0 }
 0x7a7   : > { %1564 = vadd.xlane.f32.xlu0 %v1563_v8 }
 0x82c   : > { %v1562_v56 = vpop.xlane.xlu0 %1561 }
 0x82d   : > { %v1566_v57 = vmul.f32 0.03125, %v1562_v56 }
 0x82f   : > { %v1568_v58 = vadd.f32 1e-05, %v1566_v57 }
 0x830   : > { %v1565_v59 = vpop.xlane.xlu0 %1564 }
 0x831   : > { %2298 = vrsqrt.f32 %v1568_v58  ;;  %v1567_v60 = vmul.f32 0.03125, %v1565_v59 }
 0x833   : > { %v1569_v61 = vadd.f32 1e-05, %v1567_v60 }
 0x835   : > { %2300 = vrsqrt.f32 %v1569_v61 }
 0x83e   : > { %v2299_v62 = vpop.eup %2298 }
 0x83f   : > { %v1572_v63 = vmul.f32 %v2299_v62, %v1556_v7 }
 0x841   : > { %v1578_v4 = vmul.f32 %v1577_v0, %v1572_v63 }
 0x842   : > { %v2301_v2 = vpop.eup %2300 }
 0x843   : > { %v1573_v3 = vmul.f32 %v2301_v2, %v1557_v51  ;;  %v1584_v9 = vadd.f32 %v1583_v5, %v1578_v4  ;;  %v1692_v51 = vrot.slane %v2516_v33, %v1691_v49 }
 0x845   : > { %v1579_v6 = vmul.f32 %v1577_v0, %v1573_v3 }
 0x847   : > { %v1585_v10 = vadd.f32 %v1583_v5, %v1579_v6 }
 0x849   : > { %v1586_v11 = vpack.c.bf16 %v1585_v10, %v1584_v9 }
 0x84b   : > { %2161 = vmatmul.mubr.msk.bf16.vlgmr.msra.gmra.mxu0 %vm459_vm3, %v1586_v11 }
 0x90b   : > { %v1647_v21 = vpop.f32.mrf.mxu0 }
 0x90c   : > { %v1648_v23 = vadd.f32 %v1973_v20, %v1647_v21 }
 0x90d   : > { %v2162_v24 = vpop.f32.mrf.mxu0 }
 0x90e   : > { %v1656_v25 = vmul.f32 0.044715, %v1648_v23  ;;  %v1654_v44 = vmul.f32 0.5, %v1648_v23 }
 0x90f   : > { %v1650_v26 = vpop.f32.mrf.mxu0 }
 0x910   : > { %v1658_v27 = vmul.f32 %v1656_v25, %v1648_v23  ;;  %v1651_v28 = vadd.f32 %v1973_v20, %v1650_v26 }
 0x911   : > { %v2163_v29 = vpop.f32.mrf.mxu0 }
 0x912   : > { %v1660_v30 = vmul.f32 %v1658_v27, %v1648_v23  ;;  %v1657_v32 = vmul.f32 0.044715, %v1651_v28  ;;  %v1655_v45 = vmul.f32 0.5, %v1651_v28 }
 0x914   : > { %v1662_v34 = vadd.f32 %v1660_v30, %v1648_v23  ;;  %v1659_v35 = vmul.f32 %v1657_v32, %v1651_v28 }
 0x916   : > { %v1664_v36 = vmul.f32 0.7978846, %v1662_v34  ;;  %v1661_v22 = vmul.f32 %v1659_v35, %v1651_v28 }
 0x918   : > { %2302 = vtanh.f32 %v1664_v36  ;;  %v1663_v37 = vadd.f32 %v1661_v22, %v1651_v28 }
 0x91a   : > { %v1665_v39 = vmul.f32 0.7978846, %v1663_v37 }
 0x91c   : > { %2304 = vtanh.f32 %v1665_v39 }
 0x925   : > { %v2303_v40 = vpop.eup %2302 }
 0x926   : > { %v1668_v41 = vadd.f32 1.0, %v2303_v40 }
 0x928   : > { %v1670_v7 = vmul.f32 %v1668_v41, %v1654_v44 }
 0x929   : > { %v2305_v42 = vpop.eup %2304 }
 0x92a   : > { %v1669_v46 = vadd.f32 1.0, %v2305_v42 }
 0x92c   : > { %v1671_v47 = vmul.f32 %v1669_v46, %v1655_v45 }
 0x92e   : > { %v1672_v48 = vpack.c.bf16 %v1671_v47, %v1670_v7 }
 0x930   : > { %2181 = vmatmul.mubr.bf16.vlgmr.msra.gmra.mxu1 %v1672_v48 }
 0x9f0   : > { %v1775_v52 = vpop.f32.mrf.mxu1 }
 0x9f1   : > { %v1776_v50 = vadd.f32 %v1775_v52, %v1692_v51 }
 0x9f2   : > { %v2182_v8 = vpop.f32.mrf.mxu1 }
 0x9f3   : > { %v1782_v53 = vadd.f32 %v1776_v50, %v2708_v38 }
 0x9f4   : > { %v1778_v55 = vpop.f32.mrf.mxu1 }
 0x9f5   : > { %1784 = vst.msk [vmem:[#allocation2] sm:$0xff] %vm459_vm3, %v1782_v53  ;;  %v1779_v56 = vadd.f32 %v1778_v55, %v1692_v51  ;;  %1789 = sbr.rel (%p1985_p6) target bundleno = 2555 (0x9fb), region = 60 }
 0x9f6   : > { %v2183_v57 = vpop.f32.mrf.mxu1 }
 0x9f7   : > { %v1783_v58 = vadd.f32 %v1779_v56, %v2713_v43 }
 0x9f9   : > { %1785 = vst.msk [vmem:[#allocation2 + $0x8] sm:$0xff] %vm459_vm3, %v1783_v58 }
 0x9fa   : > { %1790 = vst.msk [vmem:[#allocation4] sm:$0xff] %vm459_vm3, %v1782_v53  ;;  %1791 = vst.msk [vmem:[#allocation4 + $0x8] sm:$0xff] %vm459_vm3, %v1783_v58 }
 0x9fb PF: > { %s2798_s10 = sadd.s32 4294967295, %s2356_s29   ;;  %s2375_s11 = smov [#allocation4]  }
 0x9fc   : > { %p2760_p7 = scmp.eq.s32.totalorder %s2798_s10, 3  ;;  %s1801_s2 = sshll.u32 %s2375_s11, 4  ;;  %s1802_s2 = int_to_ptr.vmem [resolvable:$true] %s1801_s2 }
 0x9fd   : > { %s2306_s30 = scalar_lea.vmem %s1802_s2, 256  ;;  %p2313_p11 = scmp.lt.s32.totalorder %s1802_s2, %s1802_s2 }
 0x9fe   : > { %p2307_p8 = scmp.ne.s32.totalorder %s1802_s2, %s2306_s30  ;;  %p2314_p12 = scmp.lt.s32.totalorder %s2306_s30, %s2306_s30 }
 0xa00   : > { %p2308_p9 = pnand %p2307_p8, %p2760_p7  ;;  %p2315_p13 = por %p2314_p12, %p2313_p11 }
 0xa02   : > { %p2309_p10 = pneg %p2308_p9 }
 0xa04   : > { %p2316_p0 = pnand %p2315_p13, %p2309_p10 }
 0xa06   : > { %2319 = shalt.err (!%p2316_p0)
}
 0xa07   : > { %s2376_s27 = smov 128  }
 0xa08   : > { %2185 = dma.vmem_to_hbm [thread:$0]  (%p2760_p7), %s1802_s2, 256, %s2793_s8, [#allocation5], %s2376_s27, %s2376_s27, %s2372_s20  }
 0xa09   : > { %2343 = dma.done.wait (%p2760_p7), [#allocation5], 256  }
 0xa0a   : > { %2345 = vsyncadd (%p2760_p7), [#allocation5], 4294967040 }
 0xa0b PF: > { %s19_s29 = sadd.s32 1, %s2356_s29   ;;  %s2800_s27 = smov %s2352_s28 }
 0xa0c   : > { %p16_p1 = scmp.ge.s32.totalorder %s19_s29, 6   ;;  %s2801_s28 = smov %s2803_s9 }
 0xa0e   :  { %18 = sbr.rel (!%p16_p1) target bundleno = 5 (0x5), region = 109 }
 0xa13   :  { %1817 = vsyncpa [#allocation5], 1 }
 0xa14   :  { %1819 = vsyncpa [#allocation5 + $0x1], 1 }

</bundles_post_ra>
